<compile_context>
chip_gen: v7x
topology: tpu7x:2x2x1
jax: 0.10.0
libtpu: 0.0.40
codegen_flags: <defaults>
</compile_context>

<pallas_src>
import math
import functools

import jax
import jax.numpy as jnp
from jax import lax
from jax.experimental import pallas as pl
from jax.experimental.pallas import tpu as pltpu


_TQ = 128  # query-tile size inside the decoder kernel (flash-style row blocking)


def _vmem_limit_bytes():
    # Size the scoped-VMEM budget against the actual chip (~3/4 of physical:
    # ~96 MiB on v5e/v6e, ~48 MiB on v7x); fall back to a safe 64 MiB.
    try:
        return int(pltpu.get_tpu_info().vmem_capacity_bytes * 3 // 4)
    except Exception:  # pragma: no cover - conservative fallback
        return 64 * 1024 * 1024


def _layernorm(x, gamma, beta, eps=1e-5):
    mean = jnp.mean(x, axis=-1, keepdims=True)
    var = jnp.mean(jnp.square(x - mean), axis=-1, keepdims=True)
    return (x - mean) * lax.rsqrt(var + eps) * gamma + beta


# --------------------------------------------------------------------------
# Fused decoder stack kernel.  grid = (B, L).
# The y output block (index constant along the layer axis) stays resident in
# VMEM and carries the activation layer -> layer; the final LayerNorm is
# applied on the last layer step before the write-back.
# --------------------------------------------------------------------------
def _decoder_stack_kernel(n_heads, with_residuals,
                          x_ref,
                          ln1_g, ln1_b, wqkv, bqkv, wproj, bproj,
                          ln2_g, ln2_b, w1, b1, w2, b2,
                          lnf_g, lnf_b,
                          y_ref, attn_ref):
    l = pl.program_id(1)
    is_last = l == pl.num_programs(1) - 1
    bf16 = jnp.bfloat16

    # Initialize the VMEM-resident carry from the embedding input at layer 0.
    @pl.when(l == 0)
    def _():
        y_ref[...] = x_ref[...]

    x = y_ref[...]                                   # (N, D) f32 carry
    N, D = x.shape
    H = n_heads
    hd = D // H

    # --- LayerNorm 1 (f32) ---
    h = _layernorm(x, ln1_g[...], ln1_b[...])        # (N, D)

    # --- fused lane-dense QKV projection (bf16 MXU, f32 accumulation).
    # The softmax 1/sqrt(hd) scale is folded into the Q weights/bias at init.
    qkv = jnp.dot(h.astype(bf16), wqkv[...],
                  preferred_element_type=jnp.float32) + bqkv[...]   # (N, 3D)

    # Head split: one 2D transpose then layout-preserving sublane-dim reshape.
    qkvt = qkv.T                                      # (3D, N)
    q_all = jnp.swapaxes(qkvt[0:D].reshape(H, hd, N), 1, 2)         # (H, N, hd)
    kt = qkvt[D:2 * D].reshape(H, hd, N).astype(bf16)                # (H, hd, N)
    vt = qkvt[2 * D:].reshape(H, hd, N).astype(bf16)                 # (H, hd, N)

    # --- attention, query-tiled (bounds live VMEM to O(H*tq*N)) ---
    for q0 in range(0, N, _TQ):
        tq = min(_TQ, N - q0)
        q_t = q_all[:, q0:q0 + tq, :].astype(bf16)    # (H, tq, hd)

        # scores: standard-orientation batched matmul, f32 accumulation
        s = jnp.einsum('hqe,hek->hqk', q_t, kt,
                       preferred_element_type=jnp.float32)           # (H, tq, N)

        row = q0 + lax.broadcasted_iota(jnp.int32, (tq, N), 0)
        col = lax.broadcasted_iota(jnp.int32, (tq, N), 1)
        s = jnp.where((col <= row)[None, :, :], s, -1e30)

        m = jnp.max(s, axis=-1, keepdims=True)
        e = jnp.exp(s - m)
        p = e * pl.reciprocal(jnp.sum(e, axis=-1, keepdims=True), approx=True)
        attn_ref[:, q0:q0 + tq, :] = p.astype(attn_ref.dtype)

        # context and per-head output projection (no transposes on this path)
        ctx = jnp.einsum('hqk,hdk->hqd', p.astype(bf16), vt,
                         preferred_element_type=jnp.float32)         # (H, tq, hd)
        proj = jnp.einsum('hqd,hdo->hqo', ctx.astype(bf16), wproj[...],
                          preferred_element_type=jnp.float32)        # (H, tq, D)
        attn_out = jnp.sum(proj, axis=0) + bproj[...]                # (tq, D)

        # --- LN2 + MLP (dropout layers are identity in eval mode) ---
        h_t = h[q0:q0 + tq, :]
        if with_residuals:
            x1 = h_t + attn_out              # residual on post-LN1 value (per reference)
            h2 = _layernorm(x1, ln2_g[...], ln2_b[...])
            hid = jax.nn.gelu(
                jnp.dot(h2.astype(bf16), w1[...],
                        preferred_element_type=jnp.float32) + b1[...],
                approximate=True)
            out_t = h2 + (jnp.dot(hid.astype(bf16), w2[...],
                                  preferred_element_type=jnp.float32) + b2[...])
        else:
            h2 = _layernorm(attn_out, ln2_g[...], ln2_b[...])
            hid = jax.nn.gelu(
                jnp.dot(h2.astype(bf16), w1[...],
                        preferred_element_type=jnp.float32) + b1[...],
                approximate=True)
            out_t = jnp.dot(hid.astype(bf16), w2[...],
                            preferred_element_type=jnp.float32) + b2[...]

        # Final LayerNorm fused into the last layer step (LM head is then a
        # pure matmul, no per-vocab-tile LN recompute).
        @pl.when(is_last)
        def _():
            y_ref[q0:q0 + tq, :] = _layernorm(out_t, lnf_g[...], lnf_b[...])

        @pl.when(jnp.logical_not(is_last))
        def _():
            y_ref[q0:q0 + tq, :] = out_t


def decoder_stack(x, p, n_heads, with_residuals, attn_dtype=jnp.float32):
    B, N, D = x.shape
    L = p["wqkv"].shape[0]
    H = n_heads

    layer_weights = [p["ln1_g"], p["ln1_b"], p["wqkv"], p["bqkv"], p["wproj"],
                     p["bproj"], p["ln2_g"], p["ln2_b"], p["w1"], p["b1"],
                     p["w2"], p["b2"]]

    def layer_spec(a):
        zeros = (0,) * (a.ndim - 1)
        return pl.BlockSpec((None,) + a.shape[1:], lambda b, l: (l,) + zeros)

    # TODO(synk): for very large D*M on v7x (64 MiB VMEM), additionally tile
    # the MLP hidden dim / qkv output dim instead of taking full-width blocks.
    kernel = functools.partial(_decoder_stack_kernel, n_heads, with_residuals)
    y, attn = pl.pallas_call(
        kernel,
        out_shape=(jax.ShapeDtypeStruct((B, N, D), jnp.float32),
                   jax.ShapeDtypeStruct((B, L, H, N, N), attn_dtype)),
        grid=(B, L),
        in_specs=[pl.BlockSpec((None, N, D), lambda b, l: (b, 0, 0))]
                 + [layer_spec(a) for a in layer_weights]
                 + [pl.BlockSpec((1, D), lambda b, l: (0, 0)),
                    pl.BlockSpec((1, D), lambda b, l: (0, 0))],
        out_specs=[pl.BlockSpec((None, N, D), lambda b, l: (b, 0, 0)),
                   pl.BlockSpec((None, None, H, N, N),
                                lambda b, l: (b, l, 0, 0, 0))],
        compiler_params=pltpu.CompilerParams(
            dimension_semantics=("parallel", "arbitrary"),
            vmem_limit_bytes=_vmem_limit_bytes()),
    )(x, *layer_weights, p["ln_f_g"], p["ln_f_b"])
    return y, attn


# --------------------------------------------------------------------------
# word_prediction Linear, tiled over the (padded) vocab axis.  The final
# LayerNorm was already applied inside the decoder kernel.
# --------------------------------------------------------------------------
def _lm_head_kernel(x_ref, w_ref, b_ref, out_ref):
    out_ref[...] = jnp.dot(x_ref[...].astype(jnp.bfloat16), w_ref[...],
                           preferred_element_type=jnp.float32) + b_ref[...]


def lm_head(x, w, b, tile_v):
    B, N, D = x.shape
    Vp = w.shape[1]                      # padded vocab (multiple of tile_v)
    nv = Vp // tile_v
    return pl.pallas_call(
        _lm_head_kernel,
        out_shape=jax.ShapeDtypeStruct((B, N, Vp), jnp.float32),
        grid=(B, nv),
        in_specs=[pl.BlockSpec((None, N, D), lambda b, v: (b, 0, 0)),
                  pl.BlockSpec((D, tile_v), lambda b, v: (0, v)),
                  pl.BlockSpec((1, tile_v), lambda b, v: (0, v))],
        out_specs=pl.BlockSpec((None, N, tile_v), lambda b, v: (b, 0, v)),
        compiler_params=pltpu.CompilerParams(
            dimension_semantics=("parallel", "parallel"),
            vmem_limit_bytes=_vmem_limit_bytes()),
    )(x, w, b)


# --------------------------------------------------------------------------
# Parameter construction (deterministic, normal(0, 0.02) like the torch init).
# Matmul weights are stored bf16 (MXU-native on v5e/v6e/v7x); biases / LN
# parameters / embeddings stay f32.  The softmax 1/sqrt(hd) scale is folded
# into the Q projection.  The LM-head weight is padded to a lane-dense,
# tile-aligned vocab size.
# --------------------------------------------------------------------------
def _round_up(v, m):
    return (v + m - 1) // m * m


def init_params(key, n_layers, n_heads, D, M, V, max_ctx):
    assert D % n_heads == 0, "embed_size must be divisible by n_heads"
    hd = D // n_heads
    q_scale = 1.0 / math.sqrt(hd)
    L = n_layers
    bf16 = jnp.bfloat16

    ks = iter(jax.random.split(key, 3 + 6 * n_layers))
    nrm = lambda k, s: 0.02 * jax.random.normal(k, s, dtype=jnp.float32)

    tok_emb = nrm(next(ks), (V, D))
    pos_emb = nrm(next(ks), (max_ctx, D))

    # LM head: pad vocab to a multiple of the lane-dense tile.
    tile_v = min(1024, _round_up(V, 128))
    Vp = tile_v * ((V + tile_v - 1) // tile_v)
    w_out = jnp.zeros((D, Vp), jnp.float32).at[:, :V].set(nrm(next(ks), (D, V)))

    wq, wk, wv, wproj, w1, w2 = [], [], [], [], [], []
    for _ in range(n_layers):
        wq.append(nrm(next(ks), (D, D)) * q_scale)   # softmax scale folded in
        wk.append(nrm(next(ks), (D, D)))
        wv.append(nrm(next(ks), (D, D)))
        wproj.append(nrm(next(ks), (D, D)).reshape(n_heads, hd, D))  # per-head
        w1.append(nrm(next(ks), (D, M)))
        w2.append(nrm(next(ks), (M, D)))

    wqkv = jnp.concatenate(
        [jnp.stack(wq), jnp.stack(wk), jnp.stack(wv)], axis=-1)      # (L, D, 3D)

    return {
        "tok_emb": tok_emb,
        "pos_emb": pos_emb,
        "ln1_g": jnp.ones((L, 1, D), jnp.float32),
        "ln1_b": jnp.zeros((L, 1, D), jnp.float32),
        "wqkv": wqkv.astype(bf16),                    # (L, D, 3D), q pre-scaled
        # lane-dense qkv bias; the q third would also carry the folded
        # 1/sqrt(hd) factor (reference init zeroes all Linear biases).
        "bqkv": jnp.zeros((L, 1, 3 * D), jnp.float32),
        "wproj": jnp.stack(wproj).astype(bf16),       # (L, H, hd, D)
        "bproj": jnp.zeros((L, 1, D), jnp.float32),
        "ln2_g": jnp.ones((L, 1, D), jnp.float32),
        "ln2_b": jnp.zeros((L, 1, D), jnp.float32),
        "w1": jnp.stack(w1).astype(bf16),             # (L, D, M)
        "b1": jnp.zeros((L, 1, M), jnp.float32),
        "w2": jnp.stack(w2).astype(bf16),             # (L, M, D)
        "b2": jnp.zeros((L, 1, D), jnp.float32),
        "ln_f_g": jnp.ones((1, D), jnp.float32),
        "ln_f_b": jnp.zeros((1, D), jnp.float32),
        "w_out": w_out.astype(bf16),                  # (D, Vp)
        "b_out": jnp.zeros((1, Vp), jnp.float32),
        "vocab_size": V,
        "tile_v": tile_v,
    }


# --------------------------------------------------------------------------
# Full TransformerLM forward
# --------------------------------------------------------------------------
def transformer_lm_forward(tokens, params, n_heads, with_residuals, max_ctx):
    B, N = tokens.shape
    assert N <= max_ctx, "Sequence length exceeds maximum context length"
    # TODO(synk): embedding gather (data-dependent token lookup) stays in plain JAX.
    x = params["tok_emb"][tokens] + params["pos_emb"][:N][None, :, :]

    y, attn_all = decoder_stack(x, params, n_heads, with_residuals)
    # y already has the final LayerNorm applied (fused into the last layer).
    logits = lm_head(y, params["w_out"], params["b_out"], params["tile_v"])
    logits = logits[:, :, :params["vocab_size"]]

    # attn_all is (B, L, H, N, N); layer l's weights are attn_all[:, l].
    # Returned stacked to avoid L extra full-tensor copies.
    return logits, attn_all


# --------------------------------------------------------------------------
if __name__ == "__main__":
    # small config
    n_layers = 2
    n_heads = 4
    embed_size = 32
    mlp_hidden = 64
    vocab_size = 128
    max_context_len = 16
    with_residuals = True
    B, N = 2, 8

    key = jax.random.PRNGKey(0)
    pkey, tkey = jax.random.split(key)
    params = init_params(pkey, n_layers, n_heads, embed_size,
                         mlp_hidden, vocab_size, max_context_len)
    tokens = jax.random.randint(tkey, (B, N), 0, vocab_size, dtype=jnp.int32)

    logits, attn_all = transformer_lm_forward(
        tokens, params, n_heads, with_residuals, max_context_len)
    logits = jax.block_until_ready(logits)
    attn_all = jax.block_until_ready(attn_all)

    assert logits.shape == (B, N, vocab_size)
    assert attn_all.shape == (B, n_layers, n_heads, N, N)
    assert bool(jnp.all(jnp.isfinite(logits)))
    assert bool(jnp.all(jnp.isfinite(attn_all)))
    print("KERNEL_OK")
</pallas_src>

<mosaic_0001>
module attributes {stable_mosaic.version = 11 : i64} {
  func.func @_decoder_stack_kernel(%arg0: i32, %arg1: i32, %arg2: memref<1x8x32xf32, #tpu.memory_space<vmem>>, %arg3: memref<1x1x32xf32, #tpu.memory_space<vmem>>, %arg4: memref<1x1x32xf32, #tpu.memory_space<vmem>>, %arg5: memref<1x32x96xbf16, #tpu.memory_space<vmem>>, %arg6: memref<1x1x96xf32, #tpu.memory_space<vmem>>, %arg7: memref<1x4x8x32xbf16, #tpu.memory_space<vmem>>, %arg8: memref<1x1x32xf32, #tpu.memory_space<vmem>>, %arg9: memref<1x1x32xf32, #tpu.memory_space<vmem>>, %arg10: memref<1x1x32xf32, #tpu.memory_space<vmem>>, %arg11: memref<1x32x64xbf16, #tpu.memory_space<vmem>>, %arg12: memref<1x1x64xf32, #tpu.memory_space<vmem>>, %arg13: memref<1x64x32xbf16, #tpu.memory_space<vmem>>, %arg14: memref<1x1x32xf32, #tpu.memory_space<vmem>>, %arg15: memref<1x32xf32, #tpu.memory_space<vmem>>, %arg16: memref<1x32xf32, #tpu.memory_space<vmem>>, %arg17: memref<1x8x32xf32, #tpu.memory_space<vmem>>, %arg18: memref<1x1x4x8x8xf32, #tpu.memory_space<vmem>>) attributes {dimension_semantics = [#tpu.dimension_semantics<parallel>, #tpu.dimension_semantics<arbitrary>], iteration_bounds = array<i64: 2, 2>, scalar_prefetch = 0 : i64, scratch_operands = 0 : i64, tpu.core_type = #tpu.core_type<tc>, window_params = [{transform_indices = @transform_0, window_bounds = array<i64: 1, 8, 32>}, {transform_indices = @transform_1, window_bounds = array<i64: 1, 1, 32>}, {transform_indices = @transform_2, window_bounds = array<i64: 1, 1, 32>}, {transform_indices = @transform_3, window_bounds = array<i64: 1, 32, 96>}, {transform_indices = @transform_4, window_bounds = array<i64: 1, 1, 96>}, {transform_indices = @transform_5, window_bounds = array<i64: 1, 4, 8, 32>}, {transform_indices = @transform_6, window_bounds = array<i64: 1, 1, 32>}, {transform_indices = @transform_7, window_bounds = array<i64: 1, 1, 32>}, {transform_indices = @transform_8, window_bounds = array<i64: 1, 1, 32>}, {transform_indices = @transform_9, window_bounds = array<i64: 1, 32, 64>}, {transform_indices = @transform_10, window_bounds = array<i64: 1, 1, 64>}, {transform_indices = @transform_11, window_bounds = array<i64: 1, 64, 32>}, {transform_indices = @transform_12, window_bounds = array<i64: 1, 1, 32>}, {pipeline_mode = #tpu.pipeline_mode<synchronous>, transform_indices = @transform_13, window_bounds = array<i64: 1, 32>}, {pipeline_mode = #tpu.pipeline_mode<synchronous>, transform_indices = @transform_14, window_bounds = array<i64: 1, 32>}, {transform_indices = @transform_15, window_bounds = array<i64: 1, 8, 32>}, {transform_indices = @transform_16, window_bounds = array<i64: 1, 1, 4, 8, 8>}]} {
    %c1_i32 = arith.constant 1 : i32
    %0 = arith.cmpi eq, %arg1, %c1_i32 : i32
    %c0_i32 = arith.constant 0 : i32
    %1 = arith.cmpi eq, %arg1, %c0_i32 : i32
    %2 = arith.extui %1 : i1 to i32
    %c0_i32_0 = arith.constant 0 : i32
    %3 = arith.cmpi ne, %2, %c0_i32_0 : i32
    scf.if %3 {
      %c0_71 = arith.constant 0 : index
      %c0_72 = arith.constant 0 : index
      %c0_73 = arith.constant 0 : index
      %148 = vector.load %arg2[%c0_71, %c0_72, %c0_73] : memref<1x8x32xf32, #tpu.memory_space<vmem>>, vector<1x8x32xf32>
      %149 = vector.shape_cast %148 : vector<1x8x32xf32> to vector<8x32xf32>
      %c0_74 = arith.constant 0 : index
      %c0_75 = arith.constant 0 : index
      %c0_76 = arith.constant 0 : index
      %150 = vector.load %arg17[%c0_74, %c0_75, %c0_76] : memref<1x8x32xf32, #tpu.memory_space<vmem>>, vector<1x8x32xf32>
      %151 = vector.shape_cast %150 : vector<1x8x32xf32> to vector<8x32xf32>
      %152 = vector.shape_cast %149 : vector<8x32xf32> to vector<1x8x32xf32>
      tpu.vector_store %arg17[%c0_74, %c0_75, %c0_76], %152 {strides = array<i32>} : memref<1x8x32xf32, #tpu.memory_space<vmem>>, vector<1x8x32xf32>,
    } else {
    }
    %c0 = arith.constant 0 : index
    %c0_1 = arith.constant 0 : index
    %c0_2 = arith.constant 0 : index
    %4 = vector.load %arg17[%c0, %c0_1, %c0_2] : memref<1x8x32xf32, #tpu.memory_space<vmem>>, vector<1x8x32xf32>
    %5 = vector.shape_cast %4 : vector<1x8x32xf32> to vector<8x32xf32>
    %c0_3 = arith.constant 0 : index
    %c0_4 = arith.constant 0 : index
    %c0_5 = arith.constant 0 : index
    %6 = vector.load %arg3[%c0_3, %c0_4, %c0_5] : memref<1x1x32xf32, #tpu.memory_space<vmem>>, vector<1x1x32xf32>
    %7 = vector.shape_cast %6 : vector<1x1x32xf32> to vector<1x32xf32>
    %c0_6 = arith.constant 0 : index
    %c0_7 = arith.constant 0 : index
    %c0_8 = arith.constant 0 : index
    %8 = vector.load %arg4[%c0_6, %c0_7, %c0_8] : memref<1x1x32xf32, #tpu.memory_space<vmem>>, vector<1x1x32xf32>
    %9 = vector.shape_cast %8 : vector<1x1x32xf32> to vector<1x32xf32>
    %cst = arith.constant dense<0.000000e+00> : vector<8xf32>
    %10 = vector.multi_reduction <add>, %5, %cst [1] : vector<8x32xf32> to vector<8xf32>
    %11 = vector.shape_cast %10 : vector<8xf32> to vector<8x1xf32>
    %cst_9 = arith.constant 3.200000e+01 : f32
    %12 = vector.broadcast %cst_9 : f32 to vector<8x1xf32>
    %13 = arith.divf %11, %12 : vector<8x1xf32>
    %14 = vector.broadcast %13 : vector<8x1xf32> to vector<8x32xf32>
    %15 = arith.subf %5, %14 : vector<8x32xf32>
    %16 = arith.mulf %15, %15 : vector<8x32xf32>
    %cst_10 = arith.constant dense<0.000000e+00> : vector<8xf32>
    %17 = vector.multi_reduction <add>, %16, %cst_10 [1] : vector<8x32xf32> to vector<8xf32>
    %18 = vector.shape_cast %17 : vector<8xf32> to vector<8x1xf32>
    %cst_11 = arith.constant 3.200000e+01 : f32
    %19 = vector.broadcast %cst_11 : f32 to vector<8x1xf32>
    %20 = arith.divf %18, %19 : vector<8x1xf32>
    %21 = vector.broadcast %13 : vector<8x1xf32> to vector<8x32xf32>
    %22 = arith.subf %5, %21 : vector<8x32xf32>
    %cst_12 = arith.constant 9.99999974E-6 : f32
    %23 = vector.broadcast %cst_12 : f32 to vector<8x1xf32>
    %24 = arith.addf %20, %23 : vector<8x1xf32>
    %25 = math.rsqrt %24 : vector<8x1xf32>
    %26 = vector.broadcast %25 : vector<8x1xf32> to vector<8x32xf32>
    %27 = arith.mulf %22, %26 : vector<8x32xf32>
    %28 = vector.broadcast %7 : vector<1x32xf32> to vector<8x32xf32>
    %29 = arith.mulf %27, %28 : vector<8x32xf32>
    %30 = vector.broadcast %9 : vector<1x32xf32> to vector<8x32xf32>
    %31 = arith.addf %29, %30 : vector<8x32xf32>
    %32 = arith.truncf %31 : vector<8x32xf32> to vector<8x32xbf16>
    %c0_13 = arith.constant 0 : index
    %c0_14 = arith.constant 0 : index
    %c0_15 = arith.constant 0 : index
    %33 = vector.load %arg5[%c0_13, %c0_14, %c0_15] : memref<1x32x96xbf16, #tpu.memory_space<vmem>>, vector<1x32x96xbf16>
    %34 = vector.shape_cast %33 : vector<1x32x96xbf16> to vector<32x96xbf16>
    %cst_16 = arith.constant dense<0.000000e+00> : vector<8x96xf32>
    %35 = tpu.matmul %32, %34, %cst_16 {dimension_numbers = #tpu.dot_dimension_numbers<[1], [0], [0], [1], [0, 0, 1, 1], [], []>} : vector<8x32xbf16>, vector<32x96xbf16>, vector<8x96xf32> -> vector<8x96xf32>
    %c0_17 = arith.constant 0 : index
    %c0_18 = arith.constant 0 : index
    %c0_19 = arith.constant 0 : index
    %36 = vector.load %arg6[%c0_17, %c0_18, %c0_19] : memref<1x1x96xf32, #tpu.memory_space<vmem>>, vector<1x1x96xf32>
    %37 = vector.shape_cast %36 : vector<1x1x96xf32> to vector<1x96xf32>
    %38 = vector.broadcast %37 : vector<1x96xf32> to vector<8x96xf32>
    %39 = arith.addf %35, %38 : vector<8x96xf32>
    %40 = tpu.transpose %39, [1, 0] : vector<8x96xf32> -> vector<96x8xf32>
    %41 = vector.extract_strided_slice %40 {offsets = [0, 0], sizes = [32, 8], strides = [1, 1]} : vector<96x8xf32> to vector<32x8xf32>
    %42 = vector.shape_cast %41 : vector<32x8xf32> to vector<4x8x8xf32>
    %43 = tpu.transpose %42, [0, 2, 1] : vector<4x8x8xf32> -> vector<4x8x8xf32>
    %44 = vector.extract_strided_slice %40 {offsets = [32, 0], sizes = [32, 8], strides = [1, 1]} : vector<96x8xf32> to vector<32x8xf32>
    %45 = vector.shape_cast %44 : vector<32x8xf32> to vector<4x8x8xf32>
    %46 = arith.truncf %45 : vector<4x8x8xf32> to vector<4x8x8xbf16>
    %47 = vector.extract_strided_slice %40 {offsets = [64, 0], sizes = [32, 8], strides = [1, 1]} : vector<96x8xf32> to vector<32x8xf32>
    %48 = vector.shape_cast %47 : vector<32x8xf32> to vector<4x8x8xf32>
    %49 = arith.truncf %48 : vector<4x8x8xf32> to vector<4x8x8xbf16>
    %50 = arith.truncf %43 : vector<4x8x8xf32> to vector<4x8x8xbf16>
    "tpu.trace_start"() <{level = 10 : i32, message = "hqe,hek->hqk"}> : () -> ()
    %cst_20 = arith.constant dense<0.000000e+00> : vector<4x8x8xf32>
    %51 = tpu.matmul %50, %46, %cst_20 {dimension_numbers = #tpu.dot_dimension_numbers<[2], [1], [1], [2], [0, 0, 0, 1, 1, 2], [0], [0]>} : vector<4x8x8xbf16>, vector<4x8x8xbf16>, vector<4x8x8xf32> -> vector<4x8x8xf32>
    "tpu.trace_stop"() : () -> ()
    %52 = tpu.iota {dimensions = array<i32: 0>} : vector<8x8xi32>
    %c0_i32_21 = arith.constant 0 : i32
    %53 = vector.broadcast %c0_i32_21 : i32 to vector<8x8xi32>
    %54 = arith.addi %53, %52 : vector<8x8xi32>
    %55 = tpu.iota {dimensions = array<i32: 1>} : vector<8x8xi32>
    %56 = arith.cmpi sle, %55, %54 : vector<8x8xi32>
    %57 = vector.shape_cast %56 : vector<8x8xi1> to vector<1x8x8xi1>
    %cst_22 = arith.constant -1.000000e+30 : f32
    %58 = vector.shape_cast %57 : vector<1x8x8xi1> to vector<1x8x8xi1>
    %59 = vector.broadcast %58 : vector<1x8x8xi1> to vector<4x8x8xi1>
    %60 = vector.broadcast %cst_22 : f32 to vector<4x8x8xf32>
    %61 = arith.select %59, %51, %60 : vector<4x8x8xi1>, vector<4x8x8xf32>
    %cst_23 = arith.constant dense<0xFF800000> : vector<4x8xf32>
    %62 = vector.multi_reduction <maximumf>, %61, %cst_23 [2] : vector<4x8x8xf32> to vector<4x8xf32>
    %63 = vector.shape_cast %62 : vector<4x8xf32> to vector<4x8x1xf32>
    %64 = vector.broadcast %63 : vector<4x8x1xf32> to vector<4x8x8xf32>
    %65 = arith.subf %61, %64 : vector<4x8x8xf32>
    %66 = math.exp %65 : vector<4x8x8xf32>
    %cst_24 = arith.constant dense<0.000000e+00> : vector<4x8xf32>
    %67 = vector.multi_reduction <add>, %66, %cst_24 [2] : vector<4x8x8xf32> to vector<4x8xf32>
    %68 = vector.shape_cast %67 : vector<4x8xf32> to vector<4x8x1xf32>
    %69 = tpu.reciprocal %68 {approx = true} : vector<4x8x1xf32> -> vector<4x8x1xf32>
    %70 = vector.broadcast %69 : vector<4x8x1xf32> to vector<4x8x8xf32>
    %71 = arith.mulf %66, %70 : vector<4x8x8xf32>
    %c0_25 = arith.constant 0 : index
    %c0_26 = arith.constant 0 : index
    %c0_27 = arith.constant 0 : index
    %c0_28 = arith.constant 0 : index
    %c0_29 = arith.constant 0 : index
    %72 = vector.load %arg18[%c0_25, %c0_26, %c0_27, %c0_28, %c0_29] : memref<1x1x4x8x8xf32, #tpu.memory_space<vmem>>, vector<1x1x4x8x8xf32>
    %73 = vector.shape_cast %72 : vector<1x1x4x8x8xf32> to vector<4x8x8xf32>
    %74 = vector.shape_cast %71 : vector<4x8x8xf32> to vector<1x1x4x8x8xf32>
    tpu.vector_store %arg18[%c0_25, %c0_26, %c0_27, %c0_28, %c0_29], %74 {strides = array<i32>} : memref<1x1x4x8x8xf32, #tpu.memory_space<vmem>>, vector<1x1x4x8x8xf32>,
    %75 = arith.truncf %71 : vector<4x8x8xf32> to vector<4x8x8xbf16>
    "tpu.trace_start"() <{level = 10 : i32, message = "hqk,hdk->hqd"}> : () -> ()
    %cst_30 = arith.constant dense<0.000000e+00> : vector<4x8x8xf32>
    %76 = tpu.matmul %75, %49, %cst_30 {dimension_numbers = #tpu.dot_dimension_numbers<[2], [2], [1], [1], [0, 0, 0, 1, 1, 1], [0], [0]>} : vector<4x8x8xbf16>, vector<4x8x8xbf16>, vector<4x8x8xf32> -> vector<4x8x8xf32>
    "tpu.trace_stop"() : () -> ()
    %77 = arith.truncf %76 : vector<4x8x8xf32> to vector<4x8x8xbf16>
    %c0_31 = arith.constant 0 : index
    %c0_32 = arith.constant 0 : index
    %c0_33 = arith.constant 0 : index
    %c0_34 = arith.constant 0 : index
    %78 = vector.load %arg7[%c0_31, %c0_32, %c0_33, %c0_34] : memref<1x4x8x32xbf16, #tpu.memory_space<vmem>>, vector<1x4x8x32xbf16>
    %79 = vector.shape_cast %78 : vector<1x4x8x32xbf16> to vector<4x8x32xbf16>
    "tpu.trace_start"() <{level = 10 : i32, message = "hqd,hdo->hqo"}> : () -> ()
    %cst_35 = arith.constant dense<0.000000e+00> : vector<4x8x32xf32>
    %80 = tpu.matmul %77, %79, %cst_35 {dimension_numbers = #tpu.dot_dimension_numbers<[2], [1], [1], [2], [0, 0, 0, 1, 1, 2], [0], [0]>} : vector<4x8x8xbf16>, vector<4x8x32xbf16>, vector<4x8x32xf32> -> vector<4x8x32xf32>
    "tpu.trace_stop"() : () -> ()
    %cst_36 = arith.constant dense<0.000000e+00> : vector<8x32xf32>
    %81 = vector.multi_reduction <add>, %80, %cst_36 [0] : vector<4x8x32xf32> to vector<8x32xf32>
    %c0_37 = arith.constant 0 : index
    %c0_38 = arith.constant 0 : index
    %c0_39 = arith.constant 0 : index
    %82 = vector.load %arg8[%c0_37, %c0_38, %c0_39] : memref<1x1x32xf32, #tpu.memory_space<vmem>>, vector<1x1x32xf32>
    %83 = vector.shape_cast %82 : vector<1x1x32xf32> to vector<1x32xf32>
    %84 = vector.broadcast %83 : vector<1x32xf32> to vector<8x32xf32>
    %85 = arith.addf %81, %84 : vector<8x32xf32>
    %86 = arith.addf %31, %85 : vector<8x32xf32>
    %c0_40 = arith.constant 0 : index
    %c0_41 = arith.constant 0 : index
    %c0_42 = arith.constant 0 : index
    %87 = vector.load %arg9[%c0_40, %c0_41, %c0_42] : memref<1x1x32xf32, #tpu.memory_space<vmem>>, vector<1x1x32xf32>
    %88 = vector.shape_cast %87 : vector<1x1x32xf32> to vector<1x32xf32>
    %c0_43 = arith.constant 0 : index
    %c0_44 = arith.constant 0 : index
    %c0_45 = arith.constant 0 : index
    %89 = vector.load %arg10[%c0_43, %c0_44, %c0_45] : memref<1x1x32xf32, #tpu.memory_space<vmem>>, vector<1x1x32xf32>
    %90 = vector.shape_cast %89 : vector<1x1x32xf32> to vector<1x32xf32>
    %cst_46 = arith.constant dense<0.000000e+00> : vector<8xf32>
    %91 = vector.multi_reduction <add>, %86, %cst_46 [1] : vector<8x32xf32> to vector<8xf32>
    %92 = vector.shape_cast %91 : vector<8xf32> to vector<8x1xf32>
    %cst_47 = arith.constant 3.200000e+01 : f32
    %93 = vector.broadcast %cst_47 : f32 to vector<8x1xf32>
    %94 = arith.divf %92, %93 : vector<8x1xf32>
    %95 = vector.broadcast %94 : vector<8x1xf32> to vector<8x32xf32>
    %96 = arith.subf %86, %95 : vector<8x32xf32>
    %97 = arith.mulf %96, %96 : vector<8x32xf32>
    %cst_48 = arith.constant dense<0.000000e+00> : vector<8xf32>
    %98 = vector.multi_reduction <add>, %97, %cst_48 [1] : vector<8x32xf32> to vector<8xf32>
    %99 = vector.shape_cast %98 : vector<8xf32> to vector<8x1xf32>
    %cst_49 = arith.constant 3.200000e+01 : f32
    %100 = vector.broadcast %cst_49 : f32 to vector<8x1xf32>
    %101 = arith.divf %99, %100 : vector<8x1xf32>
    %102 = vector.broadcast %94 : vector<8x1xf32> to vector<8x32xf32>
    %103 = arith.subf %86, %102 : vector<8x32xf32>
    %cst_50 = arith.constant 9.99999974E-6 : f32
    %104 = vector.broadcast %cst_50 : f32 to vector<8x1xf32>
    %105 = arith.addf %101, %104 : vector<8x1xf32>
    %106 = math.rsqrt %105 : vector<8x1xf32>
    %107 = vector.broadcast %106 : vector<8x1xf32> to vector<8x32xf32>
    %108 = arith.mulf %103, %107 : vector<8x32xf32>
    %109 = vector.broadcast %88 : vector<1x32xf32> to vector<8x32xf32>
    %110 = arith.mulf %108, %109 : vector<8x32xf32>
    %111 = vector.broadcast %90 : vector<1x32xf32> to vector<8x32xf32>
    %112 = arith.addf %110, %111 : vector<8x32xf32>
    %113 = arith.truncf %112 : vector<8x32xf32> to vector<8x32xbf16>
    %c0_51 = arith.constant 0 : index
    %c0_52 = arith.constant 0 : index
    %c0_53 = arith.constant 0 : index
    %114 = vector.load %arg11[%c0_51, %c0_52, %c0_53] : memref<1x32x64xbf16, #tpu.memory_space<vmem>>, vector<1x32x64xbf16>
    %115 = vector.shape_cast %114 : vector<1x32x64xbf16> to vector<32x64xbf16>
    %cst_54 = arith.constant dense<0.000000e+00> : vector<8x64xf32>
    %116 = tpu.matmul %113, %115, %cst_54 {dimension_numbers = #tpu.dot_dimension_numbers<[1], [0], [0], [1], [0, 0, 1, 1], [], []>} : vector<8x32xbf16>, vector<32x64xbf16>, vector<8x64xf32> -> vector<8x64xf32>
    %c0_55 = arith.constant 0 : index
    %c0_56 = arith.constant 0 : index
    %c0_57 = arith.constant 0 : index
    %117 = vector.load %arg12[%c0_55, %c0_56, %c0_57] : memref<1x1x64xf32, #tpu.memory_space<vmem>>, vector<1x1x64xf32>
    %118 = vector.shape_cast %117 : vector<1x1x64xf32> to vector<1x64xf32>
    %119 = vector.broadcast %118 : vector<1x64xf32> to vector<8x64xf32>
    %120 = arith.addf %116, %119 : vector<8x64xf32>
    %121 = arith.mulf %120, %120 : vector<8x64xf32>
    %122 = arith.mulf %120, %121 : vector<8x64xf32>
    %cst_58 = arith.constant 4.471500e-02 : f32
    %123 = vector.broadcast %cst_58 : f32 to vector<8x64xf32>
    %124 = arith.mulf %123, %122 : vector<8x64xf32>
    %125 = arith.addf %120, %124 : vector<8x64xf32>
    %cst_59 = arith.constant 0.797884583 : f32
    %126 = vector.broadcast %cst_59 : f32 to vector<8x64xf32>
    %127 = arith.mulf %126, %125 : vector<8x64xf32>
    %128 = math.tanh %127 : vector<8x64xf32>
    %cst_60 = arith.constant 1.000000e+00 : f32
    %129 = vector.broadcast %cst_60 : f32 to vector<8x64xf32>
    %130 = arith.addf %129, %128 : vector<8x64xf32>
    %cst_61 = arith.constant 5.000000e-01 : f32
    %131 = vector.broadcast %cst_61 : f32 to vector<8x64xf32>
    %132 = arith.mulf %131, %130 : vector<8x64xf32>
    %133 = arith.mulf %120, %132 : vector<8x64xf32>
    %134 = arith.truncf %133 : vector<8x64xf32> to vector<8x64xbf16>
    %c0_62 = arith.constant 0 : index
    %c0_63 = arith.constant 0 : index
    %c0_64 = arith.constant 0 : index
    %135 = vector.load %arg13[%c0_62, %c0_63, %c0_64] : memref<1x64x32xbf16, #tpu.memory_space<vmem>>, vector<1x64x32xbf16>
    %136 = vector.shape_cast %135 : vector<1x64x32xbf16> to vector<64x32xbf16>
    %cst_65 = arith.constant dense<0.000000e+00> : vector<8x32xf32>
    %137 = tpu.matmul %134, %136, %cst_65 {dimension_numbers = #tpu.dot_dimension_numbers<[1], [0], [0], [1], [0, 0, 1, 1], [], []>} : vector<8x64xbf16>, vector<64x32xbf16>, vector<8x32xf32> -> vector<8x32xf32>
    %c0_66 = arith.constant 0 : index
    %c0_67 = arith.constant 0 : index
    %c0_68 = arith.constant 0 : index
    %138 = vector.load %arg14[%c0_66, %c0_67, %c0_68] : memref<1x1x32xf32, #tpu.memory_space<vmem>>, vector<1x1x32xf32>
    %139 = vector.shape_cast %138 : vector<1x1x32xf32> to vector<1x32xf32>
    %140 = vector.broadcast %139 : vector<1x32xf32> to vector<8x32xf32>
    %141 = arith.addf %137, %140 : vector<8x32xf32>
    %142 = arith.addf %112, %141 : vector<8x32xf32>
    %143 = arith.extui %0 : i1 to i32
    %c0_i32_69 = arith.constant 0 : i32
    %144 = arith.cmpi ne, %143, %c0_i32_69 : i32
    scf.if %144 {
      %c0_71 = arith.constant 0 : index
      %c0_72 = arith.constant 0 : index
      %148 = vector.load %arg15[%c0_71, %c0_72] : memref<1x32xf32, #tpu.memory_space<vmem>>, vector<1x32xf32>
      %c0_73 = arith.constant 0 : index
      %c0_74 = arith.constant 0 : index
      %149 = vector.load %arg16[%c0_73, %c0_74] : memref<1x32xf32, #tpu.memory_space<vmem>>, vector<1x32xf32>
      %cst_75 = arith.constant dense<0.000000e+00> : vector<8xf32>
      %150 = vector.multi_reduction <add>, %142, %cst_75 [1] : vector<8x32xf32> to vector<8xf32>
      %151 = vector.shape_cast %150 : vector<8xf32> to vector<8x1xf32>
      %cst_76 = arith.constant 3.200000e+01 : f32
      %152 = vector.broadcast %cst_76 : f32 to vector<8x1xf32>
      %153 = arith.divf %151, %152 : vector<8x1xf32>
      %154 = vector.broadcast %153 : vector<8x1xf32> to vector<8x32xf32>
      %155 = arith.subf %142, %154 : vector<8x32xf32>
      %156 = arith.mulf %155, %155 : vector<8x32xf32>
      %cst_77 = arith.constant dense<0.000000e+00> : vector<8xf32>
      %157 = vector.multi_reduction <add>, %156, %cst_77 [1] : vector<8x32xf32> to vector<8xf32>
      %158 = vector.shape_cast %157 : vector<8xf32> to vector<8x1xf32>
      %cst_78 = arith.constant 3.200000e+01 : f32
      %159 = vector.broadcast %cst_78 : f32 to vector<8x1xf32>
      %160 = arith.divf %158, %159 : vector<8x1xf32>
      %161 = vector.broadcast %153 : vector<8x1xf32> to vector<8x32xf32>
      %162 = arith.subf %142, %161 : vector<8x32xf32>
      %cst_79 = arith.constant 9.99999974E-6 : f32
      %163 = vector.broadcast %cst_79 : f32 to vector<8x1xf32>
      %164 = arith.addf %160, %163 : vector<8x1xf32>
      %165 = math.rsqrt %164 : vector<8x1xf32>
      %166 = vector.broadcast %165 : vector<8x1xf32> to vector<8x32xf32>
      %167 = arith.mulf %162, %166 : vector<8x32xf32>
      %168 = vector.broadcast %148 : vector<1x32xf32> to vector<8x32xf32>
      %169 = arith.mulf %167, %168 : vector<8x32xf32>
      %170 = vector.broadcast %149 : vector<1x32xf32> to vector<8x32xf32>
      %171 = arith.addf %169, %170 : vector<8x32xf32>
      %c0_80 = arith.constant 0 : index
      %c0_81 = arith.constant 0 : index
      %c0_82 = arith.constant 0 : index
      %172 = vector.load %arg17[%c0_80, %c0_81, %c0_82] : memref<1x8x32xf32, #tpu.memory_space<vmem>>, vector<1x8x32xf32>
      %173 = vector.shape_cast %172 : vector<1x8x32xf32> to vector<8x32xf32>
      %174 = vector.shape_cast %171 : vector<8x32xf32> to vector<1x8x32xf32>
      tpu.vector_store %arg17[%c0_80, %c0_81, %c0_82], %174 {strides = array<i32>} : memref<1x8x32xf32, #tpu.memory_space<vmem>>, vector<1x8x32xf32>,
    } else {
    }
    %true = arith.constant true
    %145 = arith.xori %0, %true : i1
    %146 = arith.extui %145 : i1 to i32
    %c0_i32_70 = arith.constant 0 : i32
    %147 = arith.cmpi ne, %146, %c0_i32_70 : i32
    scf.if %147 {
      %c0_71 = arith.constant 0 : index
      %c0_72 = arith.constant 0 : index
      %c0_73 = arith.constant 0 : index
      %148 = vector.load %arg17[%c0_71, %c0_72, %c0_73] : memref<1x8x32xf32, #tpu.memory_space<vmem>>, vector<1x8x32xf32>
      %149 = vector.shape_cast %148 : vector<1x8x32xf32> to vector<8x32xf32>
      %150 = vector.shape_cast %142 : vector<8x32xf32> to vector<1x8x32xf32>
      tpu.vector_store %arg17[%c0_71, %c0_72, %c0_73], %150 {strides = array<i32>} : memref<1x8x32xf32, #tpu.memory_space<vmem>>, vector<1x8x32xf32>,
    } else {
    }
    return
  }
  func.func @transform_0(%arg0: i32, %arg1: i32) -> (i32, i32, i32) {
    %c0_i32 = arith.constant 0 : i32
    %c0_i32_0 = arith.constant 0 : i32
    %c0_i32_1 = arith.constant 0 : i32
    return %arg0, %c0_i32, %c0_i32_0 : i32, i32, i32
  }
  func.func @transform_1(%arg0: i32, %arg1: i32) -> (i32, i32, i32) {
    %c0_i32 = arith.constant 0 : i32
    %c0_i32_0 = arith.constant 0 : i32
    %c0_i32_1 = arith.constant 0 : i32
    return %arg1, %c0_i32, %c0_i32_0 : i32, i32, i32
  }
  func.func @transform_2(%arg0: i32, %arg1: i32) -> (i32, i32, i32) {
    %c0_i32 = arith.constant 0 : i32
    %c0_i32_0 = arith.constant 0 : i32
    %c0_i32_1 = arith.constant 0 : i32
    return %arg1, %c0_i32, %c0_i32_0 : i32, i32, i32
  }
  func.func @transform_3(%arg0: i32, %arg1: i32) -> (i32, i32, i32) {
    %c0_i32 = arith.constant 0 : i32
    %c0_i32_0 = arith.constant 0 : i32
    %c0_i32_1 = arith.constant 0 : i32
    return %arg1, %c0_i32, %c0_i32_0 : i32, i32, i32
  }
  func.func @transform_4(%arg0: i32, %arg1: i32) -> (i32, i32, i32) {
    %c0_i32 = arith.constant 0 : i32
    %c0_i32_0 = arith.constant 0 : i32
    %c0_i32_1 = arith.constant 0 : i32
    return %arg1, %c0_i32, %c0_i32_0 : i32, i32, i32
  }
  func.func @transform_5(%arg0: i32, %arg1: i32) -> (i32, i32, i32, i32) {
    %c0_i32 = arith.constant 0 : i32
    %c0_i32_0 = arith.constant 0 : i32
    %c0_i32_1 = arith.constant 0 : i32
    %c0_i32_2 = arith.constant 0 : i32
    return %arg1, %c0_i32, %c0_i32_0, %c0_i32_1 : i32, i32, i32, i32
  }
  func.func @transform_6(%arg0: i32, %arg1: i32) -> (i32, i32, i32) {
    %c0_i32 = arith.constant 0 : i32
    %c0_i32_0 = arith.constant 0 : i32
    %c0_i32_1 = arith.constant 0 : i32
    return %arg1, %c0_i32, %c0_i32_0 : i32, i32, i32
  }
  func.func @transform_7(%arg0: i32, %arg1: i32) -> (i32, i32, i32) {
    %c0_i32 = arith.constant 0 : i32
    %c0_i32_0 = arith.constant 0 : i32
    %c0_i32_1 = arith.constant 0 : i32
    return %arg1, %c0_i32, %c0_i32_0 : i32, i32, i32
  }
  func.func @transform_8(%arg0: i32, %arg1: i32) -> (i32, i32, i32) {
    %c0_i32 = arith.constant 0 : i32
    %c0_i32_0 = arith.constant 0 : i32
    %c0_i32_1 = arith.constant 0 : i32
    return %arg1, %c0_i32, %c0_i32_0 : i32, i32, i32
  }
  func.func @transform_9(%arg0: i32, %arg1: i32) -> (i32, i32, i32) {
    %c0_i32 = arith.constant 0 : i32
    %c0_i32_0 = arith.constant 0 : i32
    %c0_i32_1 = arith.constant 0 : i32
    return %arg1, %c0_i32, %c0_i32_0 : i32, i32, i32
  }
  func.func @transform_10(%arg0: i32, %arg1: i32) -> (i32, i32, i32) {
    %c0_i32 = arith.constant 0 : i32
    %c0_i32_0 = arith.constant 0 : i32
    %c0_i32_1 = arith.constant 0 : i32
    return %arg1, %c0_i32, %c0_i32_0 : i32, i32, i32
  }
  func.func @transform_11(%arg0: i32, %arg1: i32) -> (i32, i32, i32) {
    %c0_i32 = arith.constant 0 : i32
    %c0_i32_0 = arith.constant 0 : i32
    %c0_i32_1 = arith.constant 0 : i32
    return %arg1, %c0_i32, %c0_i32_0 : i32, i32, i32
  }
  func.func @transform_12(%arg0: i32, %arg1: i32) -> (i32, i32, i32) {
    %c0_i32 = arith.constant 0 : i32
    %c0_i32_0 = arith.constant 0 : i32
    %c0_i32_1 = arith.constant 0 : i32
    return %arg1, %c0_i32, %c0_i32_0 : i32, i32, i32
  }
  func.func @transform_13(%arg0: i32, %arg1: i32) -> (i32, i32) {
    %c0_i32 = arith.constant 0 : i32
    %c0_i32_0 = arith.constant 0 : i32
    %c0_i32_1 = arith.constant 0 : i32
    return %c0_i32, %c0_i32_0 : i32, i32
  }
  func.func @transform_14(%arg0: i32, %arg1: i32) -> (i32, i32) {
    %c0_i32 = arith.constant 0 : i32
    %c0_i32_0 = arith.constant 0 : i32
    %c0_i32_1 = arith.constant 0 : i32
    return %c0_i32, %c0_i32_0 : i32, i32
  }
  func.func @transform_15(%arg0: i32, %arg1: i32) -> (i32, i32, i32) {
    %c0_i32 = arith.constant 0 : i32
    %c0_i32_0 = arith.constant 0 : i32
    %c0_i32_1 = arith.constant 0 : i32
    return %arg0, %c0_i32, %c0_i32_0 : i32, i32, i32
  }
  func.func @transform_16(%arg0: i32, %arg1: i32) -> (i32, i32, i32, i32, i32) {
    %c0_i32 = arith.constant 0 : i32
    %c0_i32_0 = arith.constant 0 : i32
    %c0_i32_1 = arith.constant 0 : i32
    %c0_i32_2 = arith.constant 0 : i32
    return %arg0, %arg1, %c0_i32, %c0_i32_0, %c0_i32_1 : i32, i32, i32, i32, i32
  }
}

</mosaic_0001>

<bundles_post_ra>
// kernel: tpu_custom_call.1
= control target key start
LH: loop header
LB: loop body
LE: loop exit
PB: predicated region body
PF: predicated region fallthrough
CT: control target
= control target key end

     0   :  { %s4811_s0 = inlined_call_operand.hbm [shape: f32[2,8,32], index: 0, kind: input, shape index: {}]   ;;  %s4812_s1 = inlined_call_operand.hbm [shape: f32[2,1,32], index: 1, kind: input, shape index: {}]   ;;  %s4813_s2 = inlined_call_operand.hbm [shape: f32[2,1,32], index: 2, kind: input, shape index: {}]   ;;  %s4814_s3 = inlined_call_operand.hbm [shape: bf16[2,32,96], index: 3, kind: input, shape index: {}]   ;;  %s4815_s4 = inlined_call_operand.hbm [shape: f32[2,1,96], index: 4, kind: input, shape index: {}]   ;;  %s4816_s5 = inlined_call_operand.hbm [shape: bf16[2,4,8,32], index: 5, kind: input, shape index: {}]   ;;  %s4817_s6 = inlined_call_operand.hbm [shape: f32[2,1,32], index: 6, kind: input, shape index: {}]   ;;  %s4818_s7 = inlined_call_operand.hbm [shape: f32[2,1,32], index: 7, kind: input, shape index: {}]   ;;  %s4819_s8 = inlined_call_operand.hbm [shape: f32[2,1,32], index: 8, kind: input, shape index: {}]   ;;  %s4820_s9 = inlined_call_operand.hbm [shape: bf16[2,32,64], index: 9, kind: input, shape index: {}]   ;;  %s4821_s10 = inlined_call_operand.hbm [shape: f32[2,1,64], index: 10, kind: input, shape index: {}]   ;;  %s4822_s11 = inlined_call_operand.hbm [shape: bf16[2,64,32], index: 11, kind: input, shape index: {}]   ;;  %s4823_s12 = inlined_call_operand.hbm [shape: f32[2,1,32], index: 12, kind: input, shape index: {}]   ;;  %s4824_s13 = inlined_call_operand.hbm [shape: f32[1,32], index: 13, kind: input, shape index: {}]   ;;  %s4825_s14 = inlined_call_operand.hbm [shape: f32[1,32], index: 14, kind: input, shape index: {}]   ;;  %s4826_s15 = inlined_call_operand.hbm [shape: f32[2,8,32], index: 15, kind: output, shape index: {0}]   ;;  %s4827_s16 = inlined_call_operand.hbm [shape: f32[2,2,4,8,8], index: 16, kind: output, shape index: {1}]  }
   0x1   :  { %4888 = sst [smem:[#allocation56_spill]] %s4811_s0 }
   0x2   :  { %4889 = sst [smem:[#allocation57_spill]] %s4812_s1 }
   0x3   :  { %4890 = sst [smem:[#allocation58_spill]] %s4813_s2 }
   0x4   :  { %4891 = sst [smem:[#allocation59_spill]] %s4814_s3 }
   0x5   :  { %4892 = sst [smem:[#allocation60_spill]] %s4815_s4 }
   0x6   :  { %4893 = sst [smem:[#allocation61_spill]] %s4816_s5 }
   0x7   :  { %4894 = sst [smem:[#allocation62_spill]] %s4817_s6 }
   0x8   :  { %4895 = sst [smem:[#allocation63_spill]] %s4818_s7 }
   0x9   :  { %4896 = sst [smem:[#allocation64_spill]] %s4819_s8 }
   0xa   :  { %4897 = sst [smem:[#allocation65_spill]] %s4820_s9 }
   0xb   :  { %4898 = sst [smem:[#allocation66_spill]] %s4821_s10 }
   0xc   :  { %4899 = sst [smem:[#allocation67_spill]] %s4822_s11 }
   0xd   :  { %4900 = sst [smem:[#allocation68_spill]] %s4823_s12 }
   0xe   :  { %4901 = sst [smem:[#allocation69_spill]] %s4824_s13 }
   0xf   :  { %4902 = sst [smem:[#allocation70_spill]] %s4825_s14 }
  0x10   :  { %4903 = sst [smem:[#allocation71_spill]] %s4826_s15 }
  0x11   :  { %4904 = sst [smem:[#allocation72_spill]] %s4827_s16 }
  0x12   :  { %22 = vsyncpa [#allocation3], 0 }
  0x13   :  { %24 = vsyncpa [#allocation3 + $0x1], 0 }
  0x14   :  { %25 = vsyncpa [#allocation6], 0 }
  0x15   :  { %27 = vsyncpa [#allocation6 + $0x1], 0 }
  0x16   :  { %28 = vsyncpa [#allocation9], 0 }
  0x17   :  { %30 = vsyncpa [#allocation9 + $0x1], 0 }
  0x18   :  { %31 = vsyncpa [#allocation12], 0 }
  0x19   :  { %33 = vsyncpa [#allocation12 + $0x1], 0 }
  0x1a   :  { %34 = vsyncpa [#allocation15], 0 }
  0x1b   :  { %36 = vsyncpa [#allocation15 + $0x1], 0 }
  0x1c   :  { %37 = vsyncpa [#allocation18], 0 }
  0x1d   :  { %39 = vsyncpa [#allocation18 + $0x1], 0 }
  0x1e   :  { %40 = vsyncpa [#allocation21], 0 }
  0x1f   :  { %42 = vsyncpa [#allocation21 + $0x1], 0 }
  0x20   :  { %43 = vsyncpa [#allocation24], 0 }
  0x21   :  { %44 = vsyncpa [#allocation4], 0 }
  0x22   :  { %46 = vsyncpa [#allocation4 + $0x1], 0 }
  0x23   :  { %47 = vsyncpa [#allocation28], 0 }
  0x24   :  { %49 = vsyncpa [#allocation28 + $0x1], 0  ;;  %s3789_s21 = smov 0   ;;  %s3791_s22 = smov 0  }
  0x25   :  { %s3793_s23 = smov 0   ;;  %s3795_s24 = smov 0  }
  0x26   :  { %s3797_s25 = smov 0   ;;  %s3799_s26 = smov 0  }
  0x27   :  { %s3801_s27 = smov 0   ;;  %s3803_s28 = smov 0  }
  0x28   :  { %s3805_s29 = smov 0   ;;  %s3807_s30 = smov 0  }
  0x29   :  { %s3809_s0 = smov 0   ;;  %s3811_s17 = smov 0  }
  0x2a   :  { %s3813_s18 = smov 0   ;;  %s3815_s19 = smov 0  }
  0x2b LB: > { %4905 = sst [smem:[#allocation39_spill]] %s3627_s21  ;;  %s3858_s20 = sadd.s32 4294967295, %s3679_s19   ;;  %s3679_s19 = sphi %s3815_s19, %s55_s19   ;;  %s3675_s18 = sphi %s3813_s18, %s5027_s18   ;;  %s3671_s17 = sphi %s3811_s17, %s5026_s17   ;;  %s3667_s0 = sphi %s3809_s0, %s5025_s0   ;;  %s3663_s30 = sphi %s3807_s30, %s5024_s30   ;;  %s3659_s29 = sphi %s3805_s29, %s5023_s29   ;;  %s3655_s28 = sphi %s3803_s28, %s5032_s28   ;;  %s3651_s27 = sphi %s3801_s27, %s5031_s27   ;;  %s3647_s26 = sphi %s3799_s26, %s5030_s26   ;;  %s3643_s25 = sphi %s3797_s25, %s5020_s25   ;;  %s3639_s24 = sphi %s3795_s24, %s5029_s24   ;;  %s3635_s23 = sphi %s3793_s23, %s5028_s23   ;;  %s3631_s22 = sphi %s3791_s22, %s5018_s22   ;;  %s3627_s21 = sphi %s3789_s21, %s5017_s21  }
  0x2c   : > { %4906 = sst [smem:[#allocation40_spill]] %s3631_s22  ;;  %p4848_p0 = scmp.eq.s32.totalorder %s3679_s19, 0 }
  0x2d   : > { %4907 = sst [smem:[#allocation41_spill]] %s3635_s23  ;;  %p4847_p1 = scmp.eq.s32.totalorder %s3858_s20, 0 }
  0x2e   : > { %4908 = sst [smem:[#allocation42_spill]] %s3643_s25  ;;  %p107_p2 = scmp.ne.s32.totalorder %s3647_s26, %s3643_s25 }
  0x2f   : > { %4909 = sst [smem:[#allocation43_spill]] %s3647_s26  ;;  %p113_p3 = scmp.ne.s32.totalorder %s3643_s25, %s3639_s24 }
  0x30   : > { %4910 = sst [smem:[#allocation44_spill]] %s3659_s29  ;;  %p4846_p4 = scmp.eq.s32.totalorder %s3858_s20, 3 }
  0x31   : > { %4911 = sst [smem:[#allocation45_spill]] %s3663_s30  ;;  %p3868_p5 = por %p107_p2, %p4848_p0 }
  0x32   : > { %4912 = sst [smem:[#allocation46_spill]] %s3667_s0  ;;  %p492_p6 = scmp.ne.s32.totalorder %s3635_s23, %s3631_s22 }
  0x33   : > { %4913 = sst [smem:[#allocation47_spill]] %s3671_s17  ;;  %p3876_p7 = por %p113_p3, %p4847_p1 }
  0x34   : > { %4914 = sst [smem:[#allocation48_spill]] %s3675_s18  ;;  %p3884_p9 = por %p492_p6, %p4846_p4 }
  0x35   : > { %4915 = sst [smem:[#allocation49_spill]] %s3858_s20  ;;  %p2558_p10 = scmp.ge.s32.totalorder %s3679_s19, 1 }
  0x36   : > { %s4917_s15 = scalar_select %p3876_p7, 1, 0 }
  0x37   : > { %s4919_s24 = scalar_select %p3884_p9, 1, 0 }
  0x38   : > { %4918 = sst [smem:[#allocation50_spill]] %s4917_s15  ;;  %p506_p11 = scmp.lt.s32.totalorder %s3679_s19, 5 }
  0x39   : > { %4920 = sst [smem:[#allocation51_spill]] %s4919_s24  ;;  %s3681_s30 = smov [#allocation23]  }
  0x3a   : > { %p3890_p12 = pnand %p2558_p10, %p506_p11  ;;  %s519_s25 = sshll.u32 %s3681_s30, 4  ;;  %s520_s25 = int_to_ptr.vmem [resolvable:$true] %s519_s25 }
  0x3b   : > { %p4844_p13 = scmp.lt.s32.totalorder %s3679_s19, 4  ;;  %s3898_s15 = sand.u32 1, %s3647_s26  }
  0x3c   : > { %s4921_s0 = scalar_select %p3890_p12, 1, 0 }
  0x3d   : > { %p2815_p2 = pneg %p3890_p12  ;;  %p3904_p3 = pnand %p4844_p13, %p3868_p5 }
  0x3e   : > { %4922 = sst [smem:[#allocation52_spill]] %s4921_s0  ;;  %s3915_s30 = sand.u32 1, %s3679_s19  }
  0x3f   : > { %s4923_s12 = scalar_select %p3904_p3, 1, 0 }
  0x40   : > { %p3910_p6 = pnand %p2815_p2, %p4847_p1  ;;  %s4925_s13 = sld [smem:[#allocation69_spill]] }
  0x42   : > { %s4924_s24 = scalar_select %p3910_p6, 1, 0 }
  0x43   : > { %p4855_p10 = pneg %p3910_p6 }
  0x46   : > { %s3027_s8 = scalar_lea.hbm %s4925_s13, 16 }
  0x47   : > { %p3028_p5 = scmp.ne.s32.totalorder %s4925_s13, %s3027_s8  ;;  %p3034_p13 = scmp.lt.u32.totalorder %s3027_s8, %s4925_s13 }
  0x49   : > { %p3030_p11 = pnand %p4855_p10, %p3028_p5 }
  0x4b   : > { %p3031_p2 = pneg %p3030_p11 }
  0x4d   : > { %p3036_p8 = pnand %p3034_p13, %p3031_p2 }
  0x4f   : > { %3039 = shalt.err (!%p3036_p8)
}
  0x50   : > { %s3040_s21 = scalar_lea.vmem %s520_s25, 16  ;;  %s3047_s6 = scalar_lea.vmem %s520_s25, 32 }
  0x51   : > { %p3041_p4 = scmp.ne.s32.totalorder %s520_s25, %s3040_s21  ;;  %p3048_p9 = scmp.lt.s32.totalorder %s520_s25, %s520_s25 }
  0x52   : > { %p3049_p7 = scmp.lt.s32.totalorder %s3047_s6, %s3040_s21 }
  0x53   : > { %p3043_p1 = pnand %p3041_p4, %p4855_p10 }
  0x54   : > { %p3050_p12 = por %p3049_p7, %p3048_p9 }
  0x55   : > { %p3044_p0 = pneg %p3043_p1 }
  0x57   : > { %p3051_p3 = pnand %p3050_p12, %p3044_p0 }
  0x59   : > { %3054 = shalt.err (!%p3051_p3)
}
  0x5a   : > { %2818 = dma.hbm_to_vmem [thread:$0]  (!%p3910_p6), %s4925_s13, 16, %s520_s25, [#allocation24]  }
  0x5b   : > { %s3940_s4 = sshll.u32 %s3671_s17, 4  ;;  %s4926_s1 = sld [smem:[#allocation57_spill]] }
  0x5c   : > { %s562_s16 = scalar_lea.vmem [#allocation5], %s3898_s15  ;;  %p4927_p1 = scmp.ne.s32.totalorder %s4923_s12, 0 }
  0x5d   : > { %s569_s6 = sshll.u32 %s562_s16, 4  ;;  %s3949_s6 = int_to_ptr.vmem [resolvable:$true] %s569_s6 }
  0x5e   : > { %p3956_p4 = pneg %p4927_p1 }
  0x60   : > { %s4928_s25 = scalar_select %p3956_p4, 1, 0 }
  0x61   : > { %s3946_s21 = scalar_lea.hbm %s4926_s1, %s3940_s4  ;;  %s3060_s13 = scalar_lea.hbm %s4926_s1, 32 }
  0x62   : > { %s3055_s2 = scalar_lea.hbm %s3946_s21, 16  ;;  %p3061_p9 = scmp.lt.u32.totalorder %s3946_s21, %s4926_s1 }
  0x63   : > { %p3056_p0 = scmp.ne.s32.totalorder %s3946_s21, %s3055_s2  ;;  %p3062_p12 = scmp.lt.u32.totalorder %s3060_s13, %s3055_s2 }
  0x64   : > { %p3064_p3 = scmp.lt.u32.totalorder %s3055_s2, %s3946_s21 }
  0x65   : > { %p3058_p7 = pnand %p3956_p4, %p3056_p0  ;;  %p3063_p13 = por %p3062_p12, %p3061_p9 }
  0x67   : > { %p3059_p8 = pneg %p3058_p7  ;;  %p3065_p5 = por %p3064_p3, %p3063_p13 }
  0x69   : > { %p3066_p11 = pnand %p3065_p5, %p3059_p8 }
  0x6b   : > { %3069 = shalt.err (!%p3066_p11)
}
  0x6c   : > { %s3070_s10 = scalar_lea.vmem %s3949_s6, 16  ;;  %s3682_s8 = smov [#allocation5]  }
  0x6d   : > { %p3071_p2 = scmp.ne.s32.totalorder %s3949_s6, %s3070_s10  ;;  %s3075_s0 = sshll.u32 %s3682_s8, 4  ;;  %s3076_s0 = int_to_ptr.vmem [resolvable:$false] %s3075_s0 }
  0x6e   : > { %s3077_s22 = scalar_lea.vmem %s3076_s0, 32  ;;  %p3078_p10 = scmp.lt.s32.totalorder %s3949_s6, %s3076_s0 }
  0x6f   : > { %p3073_p0 = pnand %p3071_p2, %p3956_p4  ;;  %p3079_p6 = scmp.lt.s32.totalorder %s3077_s22, %s3070_s10 }
  0x71   : > { %p3074_p7 = pneg %p3073_p0  ;;  %p3080_p9 = por %p3079_p6, %p3078_p10 }
  0x73   : > { %p3081_p12 = pnand %p3080_p9, %p3074_p7 }
  0x75   : > { %3084 = shalt.err (!%p3081_p12)
}
  0x76   : > { %s4929_s13 = scalar_lea.sflag [#allocation6], %s3915_s30  ;;  %s3982_s2 = sshll.u32 %s3898_s15, 4 }
  0x77   : > { %2828 = dma.hbm_to_vmem [thread:$0]  (!%p4927_p1), %s3946_s21, 16, %s3949_s6, %s4929_s13  }
  0x78   : > { %s3985_s16 = sshll.u32 %s3671_s17, 8  ;;  %s4930_s3 = sld [smem:[#allocation59_spill]] }
  0x79   : > { %s597_s22 = scalar_lea.vmem [#allocation8], %s3982_s2  ;;  %s4865_s21 = scalar_lea.sflag [#allocation9], %s3915_s30 }
  0x7a   : > { %s604_s1 = sshll.u32 %s597_s22, 4  ;;  %s3994_s1 = int_to_ptr.vmem [resolvable:$true] %s604_s1 }
  0x7e   : > { %s3991_s0 = scalar_lea.hbm %s4930_s3, %s3985_s16  ;;  %s3090_s10 = scalar_lea.hbm %s4930_s3, 512 }
  0x7f   : > { %s3085_s6 = scalar_lea.hbm %s3991_s0, 256  ;;  %p3091_p13 = scmp.lt.u32.totalorder %s3991_s0, %s4930_s3 }
  0x80   : > { %p3086_p6 = scmp.ne.s32.totalorder %s3991_s0, %s3085_s6  ;;  %p3092_p3 = scmp.lt.u32.totalorder %s3090_s10, %s3085_s6 }
  0x81   : > { %p3094_p11 = scmp.lt.u32.totalorder %s3085_s6, %s3991_s0 }
  0x82   : > { %p3088_p10 = pnand %p3086_p6, %p3956_p4  ;;  %p3093_p5 = por %p3092_p3, %p3091_p13 }
  0x84   : > { %p3089_p8 = pneg %p3088_p10  ;;  %p3095_p2 = por %p3094_p11, %p3093_p5 }
  0x86   : > { %p3096_p0 = pnand %p3095_p2, %p3089_p8 }
  0x88   : > { %3099 = shalt.err (!%p3096_p0)
}
  0x89   : > { %s3100_s22 = scalar_lea.vmem %s3994_s1, 256  ;;  %s3683_s23 = smov [#allocation8]  }
  0x8a   : > { %p3101_p7 = scmp.ne.s32.totalorder %s3994_s1, %s3100_s22  ;;  %s3105_s13 = sshll.u32 %s3683_s23, 4  ;;  %s3106_s13 = int_to_ptr.vmem [resolvable:$false] %s3105_s13 }
  0x8b   : > { %s3107_s26 = scalar_lea.vmem %s3106_s13, 512  ;;  %p3108_p6 = scmp.lt.s32.totalorder %s3994_s1, %s3106_s13 }
  0x8c   : > { %p3103_p9 = pnand %p3101_p7, %p3956_p4  ;;  %p3109_p10 = scmp.lt.s32.totalorder %s3107_s26, %s3100_s22 }
  0x8e   : > { %p3104_p12 = pneg %p3103_p9  ;;  %p3110_p13 = por %p3109_p10, %p3108_p6 }
  0x90   : > { %p3111_p3 = pnand %p3110_p13, %p3104_p12 }
  0x92   : > { %3114 = shalt.err (!%p3111_p3)
}
  0x93   : > { %s4867_s6 = smov 64   ;;  %s3685_s10 = smov 4  }
  0x94   : > { %2834 = dma.hbm_to_vmem [thread:$0]  (!%p4927_p1), %s3991_s0, 256, %s3994_s1, %s4865_s21, %s4867_s6, %s4867_s6, %s3685_s10  }
  0x95   : > { %s4931_s5 = sld [smem:[#allocation61_spill]]  ;;  %s635_s13 = scalar_lea.vmem [#allocation11], %s3982_s2 }
  0x96   : > { %s642_s26 = sshll.u32 %s635_s13, 4  ;;  %s4866_s3 = scalar_lea.sflag [#allocation12], %s3915_s30  ;;  %s4030_s26 = int_to_ptr.vmem [resolvable:$true] %s642_s26 }
  0x9b   : > { %s4027_s23 = scalar_lea.hbm %s4931_s5, %s3985_s16  ;;  %s3120_s8 = scalar_lea.hbm %s4931_s5, 512 }
  0x9c   : > { %s3115_s20 = scalar_lea.hbm %s4027_s23, 256  ;;  %p3121_p2 = scmp.lt.u32.totalorder %s4027_s23, %s4931_s5 }
  0x9d   : > { %p3116_p8 = scmp.ne.s32.totalorder %s4027_s23, %s3115_s20  ;;  %p3122_p0 = scmp.lt.u32.totalorder %s3120_s8, %s3115_s20 }
  0x9e   : > { %p3124_p9 = scmp.lt.u32.totalorder %s3115_s20, %s4027_s23 }
  0x9f   : > { %p3118_p5 = pnand %p3116_p8, %p3956_p4  ;;  %p3123_p7 = por %p3122_p0, %p3121_p2 }
  0xa1   : > { %p3119_p11 = pneg %p3118_p5  ;;  %p3125_p12 = por %p3124_p9, %p3123_p7 }
  0xa3   : > { %p3126_p6 = pnand %p3125_p12, %p3119_p11 }
  0xa5   : > { %3129 = shalt.err (!%p3126_p6)
}
  0xa6   : > { %s3130_s13 = scalar_lea.vmem %s4030_s26, 256  ;;  %s3686_s1 = smov [#allocation11]  }
  0xa7   : > { %p3131_p10 = scmp.ne.s32.totalorder %s4030_s26, %s3130_s13  ;;  %s3135_s0 = sshll.u32 %s3686_s1, 4  ;;  %s3136_s0 = int_to_ptr.vmem [resolvable:$false] %s3135_s0 }
  0xa8   : > { %s3137_s21 = scalar_lea.vmem %s3136_s0, 512  ;;  %p3138_p8 = scmp.lt.s32.totalorder %s4030_s26, %s3136_s0 }
  0xa9   : > { %p3133_p13 = pnand %p3131_p10, %p3956_p4  ;;  %p3139_p5 = scmp.lt.s32.totalorder %s3137_s21, %s3130_s13 }
  0xab   : > { %p3134_p3 = pneg %p3133_p13  ;;  %p3140_p2 = por %p3139_p5, %p3138_p8 }
  0xad   : > { %p3141_p0 = pnand %p3140_p2, %p3134_p3 }
  0xaf   : > { %3144 = shalt.err (!%p3141_p0)
}
  0xb0   : > { %2840 = dma.hbm_to_vmem [thread:$0]  (!%p4927_p1), %s4027_s23, 256, %s4030_s26, %s4866_s3, %s4867_s6, %s4867_s6, %s3685_s10  }
  0xb1   : > { %s4932_s7 = sld [smem:[#allocation63_spill]]  ;;  %s672_s13 = scalar_lea.vmem [#allocation14], %s3898_s15 }
  0xb2   : > { %s679_s1 = sshll.u32 %s672_s13, 4  ;;  %s4870_s0 = scalar_lea.sflag [#allocation15], %s3915_s30  ;;  %s680_s1 = int_to_ptr.vmem [resolvable:$true] %s679_s1 }
  0xb7   : > { %s4063_s22 = scalar_lea.hbm %s4932_s7, %s3940_s4  ;;  %s3150_s26 = scalar_lea.hbm %s4932_s7, 32 }
  0xb8   : > { %s3145_s21 = scalar_lea.hbm %s4063_s22, 16  ;;  %p3151_p12 = scmp.lt.u32.totalorder %s4063_s22, %s4932_s7 }
  0xb9   : > { %p3146_p11 = scmp.ne.s32.totalorder %s4063_s22, %s3145_s21  ;;  %p3152_p6 = scmp.lt.u32.totalorder %s3150_s26, %s3145_s21 }
  0xba   : > { %p3154_p13 = scmp.lt.u32.totalorder %s3145_s21, %s4063_s22 }
  0xbb   : > { %p3148_p7 = pnand %p3146_p11, %p3956_p4  ;;  %p3153_p10 = por %p3152_p6, %p3151_p12 }
  0xbd   : > { %p3149_p9 = pneg %p3148_p7  ;;  %p3155_p3 = por %p3154_p13, %p3153_p10 }
  0xbf   : > { %p3156_p8 = pnand %p3155_p3, %p3149_p9 }
  0xc1   : > { %3159 = shalt.err (!%p3156_p8)
}
  0xc2   : > { %s3160_s13 = scalar_lea.vmem %s680_s1, 16  ;;  %s3687_s3 = smov [#allocation14]  }
  0xc3   : > { %p3161_p5 = scmp.ne.s32.totalorder %s680_s1, %s3160_s13  ;;  %s3165_s6 = sshll.u32 %s3687_s3, 4  ;;  %s3166_s6 = int_to_ptr.vmem [resolvable:$false] %s3165_s6 }
  0xc4   : > { %s3167_s5 = scalar_lea.vmem %s3166_s6, 32  ;;  %p3168_p11 = scmp.lt.s32.totalorder %s680_s1, %s3166_s6 }
  0xc5   : > { %p3163_p2 = pnand %p3161_p5, %p3956_p4  ;;  %p3169_p7 = scmp.lt.s32.totalorder %s3167_s5, %s3160_s13 }
  0xc7   : > { %p3164_p0 = pneg %p3163_p2  ;;  %p3170_p1 = por %p3169_p7, %p3168_p11 }
  0xc9   : > { %p3171_p6 = pnand %p3170_p1, %p3164_p0 }
  0xcb   : > { %3174 = shalt.err (!%p3171_p6)
}
  0xcc   : > { %p4933_p12 = scmp.ne.s32.totalorder %s4923_s12, 0  ;;  %s4934_s9 = sld [smem:[#allocation65_spill]] }
  0xcd   : > { %s707_s6 = scalar_lea.vmem [#allocation17], %s3982_s2  ;;  %s4871_s20 = scalar_lea.sflag [#allocation18], %s3915_s30 }
  0xce   : > { %2846 = dma.hbm_to_vmem [thread:$0]  (!%p4933_p12), %s4063_s22, 16, %s680_s1, %s4870_s0  }
  0xcf   : > { %s714_s26 = sshll.u32 %s707_s6, 4  ;;  %s4093_s26 = int_to_ptr.vmem [resolvable:$true] %s714_s26 }
  0xd2   : > { %s4090_s3 = scalar_lea.hbm %s4934_s9, %s3985_s16  ;;  %s3180_s13 = scalar_lea.hbm %s4934_s9, 512 }
  0xd3   : > { %s3175_s8 = scalar_lea.hbm %s4090_s3, 256  ;;  %p3181_p13 = scmp.lt.u32.totalorder %s4090_s3, %s4934_s9 }
  0xd4   : > { %p3176_p1 = scmp.ne.s32.totalorder %s4090_s3, %s3175_s8  ;;  %p3182_p3 = scmp.lt.u32.totalorder %s3180_s13, %s3175_s8 }
  0xd5   : > { %p3184_p5 = scmp.lt.u32.totalorder %s3175_s8, %s4090_s3 }
  0xd6   : > { %p3178_p9 = pnand %p3176_p1, %p3956_p4  ;;  %p3183_p8 = por %p3182_p3, %p3181_p13 }
  0xd8   : > { %p3179_p10 = pneg %p3178_p9  ;;  %p3185_p2 = por %p3184_p5, %p3183_p8 }
  0xda   : > { %p3186_p0 = pnand %p3185_p2, %p3179_p10 }
  0xdc   : > { %3189 = shalt.err (!%p3186_p0)
}
  0xdd   : > { %s3190_s2 = scalar_lea.vmem %s4093_s26, 256  ;;  %s3688_s21 = smov [#allocation17]  }
  0xde   : > { %p3191_p11 = scmp.ne.s32.totalorder %s4093_s26, %s3190_s2  ;;  %s3195_s23 = sshll.u32 %s3688_s21, 4  ;;  %s3196_s23 = int_to_ptr.vmem [resolvable:$false] %s3195_s23 }
  0xdf   : > { %s3197_s6 = scalar_lea.vmem %s3196_s23, 512  ;;  %p3198_p1 = scmp.lt.s32.totalorder %s4093_s26, %s3196_s23 }
  0xe0   : > { %p3193_p7 = pnand %p3191_p11, %p3956_p4  ;;  %p3199_p9 = scmp.lt.s32.totalorder %s3197_s6, %s3190_s2 }
  0xe2   : > { %p3194_p6 = pneg %p3193_p7  ;;  %p3200_p13 = por %p3199_p9, %p3198_p1 }
  0xe4   : > { %p3201_p3 = pnand %p3200_p13, %p3194_p6 }
  0xe6   : > { %3204 = shalt.err (!%p3201_p3)
}
  0xe7   : > { %s4935_s8 = smov 64   ;;  %s2580_s22 = sshll.u32 %s3898_s15, 5 }
  0xe8   : > { %2852 = dma.hbm_to_vmem [thread:$0]  (!%p4933_p12), %s4090_s3, 256, %s4093_s26, %s4871_s20, %s4935_s8, %s4935_s8, %s3685_s10  }
  0xe9   : > { %s2641_s1 = sshll.u32 %s3671_s17, 9  ;;  %s4936_s11 = sld [smem:[#allocation67_spill]] }
  0xea   : > { %s745_s2 = scalar_lea.vmem [#allocation20], %s2580_s22  ;;  %s3689_s23 = smov [#allocation25]  }
  0xeb   : > { %s752_s21 = sshll.u32 %s745_s2, 4  ;;  %s4131_s6 = sshll.u32 %s3689_s23, 4  ;;  %s4129_s21 = int_to_ptr.vmem [resolvable:$true] %s752_s21  ;;  %s531_s6 = int_to_ptr.vmem [resolvable:$true] %s4131_s6 }
  0xec   : > { %s4875_s0 = scalar_lea.sflag [#allocation21], %s3915_s30 }
  0xef   : > { %s4127_s5 = scalar_lea.hbm %s4936_s11, %s2641_s1  ;;  %s3210_s13 = scalar_lea.hbm %s4936_s11, 1024 }
  0xf0   : > { %s3205_s3 = scalar_lea.hbm %s4127_s5, 512  ;;  %p3211_p2 = scmp.lt.u32.totalorder %s4127_s5, %s4936_s11 }
  0xf1   : > { %p3206_p10 = scmp.ne.s32.totalorder %s4127_s5, %s3205_s3  ;;  %p3212_p0 = scmp.lt.u32.totalorder %s3210_s13, %s3205_s3 }
  0xf2   : > { %p3214_p7 = scmp.lt.u32.totalorder %s3205_s3, %s4127_s5 }
  0xf3   : > { %p3208_p8 = pnand %p3206_p10, %p3956_p4  ;;  %p3213_p11 = por %p3212_p0, %p3211_p2 }
  0xf5   : > { %p3209_p5 = pneg %p3208_p8  ;;  %p3215_p6 = por %p3214_p7, %p3213_p11 }
  0xf7   : > { %p3216_p1 = pnand %p3215_p6, %p3209_p5 }
  0xf9   : > { %3219 = shalt.err (!%p3216_p1)
}
  0xfa   : > { %s3220_s22 = scalar_lea.vmem %s4129_s21, 512  ;;  %s3690_s2 = smov [#allocation20]  }
  0xfb   : > { %p3221_p9 = scmp.ne.s32.totalorder %s4129_s21, %s3220_s22  ;;  %s3225_s23 = sshll.u32 %s3690_s2, 4  ;;  %s3226_s23 = int_to_ptr.vmem [resolvable:$false] %s3225_s23 }
  0xfc   : > { %s3227_s20 = scalar_lea.vmem %s3226_s23, 1024  ;;  %p3228_p10 = scmp.lt.s32.totalorder %s4129_s21, %s3226_s23 }
  0xfd   : > { %p3223_p13 = pnand %p3221_p9, %p3956_p4  ;;  %p3229_p8 = scmp.lt.s32.totalorder %s3227_s20, %s3220_s22 }
  0xff   : > { %p3224_p3 = pneg %p3223_p13  ;;  %p3230_p2 = por %p3229_p8, %p3228_p10 }
 0x101   : > { %p3231_p0 = pnand %p3230_p2, %p3224_p3 }
 0x103   : > { %3234 = shalt.err (!%p3231_p0)
}
 0x104   : > { %2858 = dma.hbm_to_vmem [thread:$0]  (!%p4933_p12), %s4127_s5, 512, %s4129_s21, %s4875_s0, %s4935_s8, %s4935_s8, %s3685_s10  }
 0x105   : > { %s4937_s14 = sld [smem:[#allocation70_spill]]  ;;  %p4938_p11 = scmp.ne.s32.totalorder %s4924_s24, 0 }
 0x107   : > { %p4939_p7 = pneg %p4938_p11 }
 0x10b   : > { %s3235_s1 = scalar_lea.hbm %s4937_s14, 16 }
 0x10c   : > { %p3236_p5 = scmp.ne.s32.totalorder %s4937_s14, %s3235_s1  ;;  %p3242_p9 = scmp.lt.u32.totalorder %s3235_s1, %s4937_s14 }
 0x10e   : > { %p3238_p6 = pnand %p3236_p5, %p4939_p7 }
 0x110   : > { %p3239_p1 = pneg %p3238_p6 }
 0x112   : > { %p3244_p13 = pnand %p3242_p9, %p3239_p1 }
 0x114   : > { %3247 = shalt.err (!%p3244_p13)
}
 0x115   : > { %s3248_s10 = scalar_lea.vmem %s531_s6, 16  ;;  %p4940_p10 = pmov %p4939_p7 }
 0x116   : > { %p3249_p3 = scmp.ne.s32.totalorder %s531_s6, %s3248_s10  ;;  %s3255_s8 = scalar_lea.vmem %s531_s6, 32 }
 0x117   : > { %p3256_p0 = scmp.lt.s32.totalorder %s531_s6, %s531_s6  ;;  %p3257_p12 = scmp.lt.s32.totalorder %s3255_s8, %s3248_s10 }
 0x118   : > { %p3251_p8 = pnand %p3249_p3, %p4940_p10 }
 0x119   : > { %p3258_p4 = por %p3257_p12, %p3256_p0 }
 0x11a   : > { %p3252_p2 = pneg %p3251_p8 }
 0x11c   : > { %p3259_p5 = pnand %p3258_p4, %p3252_p2 }
 0x11e   : > { %3262 = shalt.err (!%p3259_p5)
}
 0x11f   : > { %s4941_s23 = sld [smem:[#allocation49_spill]]  ;;  %s4942_s24 = sld [smem:[#allocation43_spill]] }
 0x120   : > { %2821 = dma.hbm_to_vmem [thread:$0]  (!%p4938_p11), %s4937_s14, 16, %s531_s6, [#allocation24]  }
 0x121   : > { %s2557_s20 = sadd.s32 4294967294, %s3679_s19   ;;  %s64_s3 = sadd.s32 1, %s3671_s17 }
 0x122   : > { %s67_s26 = sadd.s32 1, %s3675_s18  ;;  %p65_p4 = scmp.ge.s32.totalorder %s64_s3, 2 }
 0x123   : > { %s74_s1 = sadd.s32 1, %s3659_s29  ;;  %p81_p12 = scmp.ne.s32.totalorder %s3659_s29, %s3655_s28 }
 0x124   : > { %p87_p7 = scmp.ne.s32.totalorder %s3655_s28, %s3651_s27  ;;  %s4943_s13 = sld [smem:[#allocation41_spill]] }
 0x125   : > { %s5034_s3 = smov (%p65_p4, %s64_s3), 0  ;;  %s5036_s26 = smov (!%p65_p4, %s67_s26), %s3675_s18 }
 0x126   : > { %4944 = sst [smem:[#allocation53_spill]] %s5034_s3  ;;  %p4945_p11 = scmp.eq.s32.totalorder %s3679_s19, 0 }
 0x127   : > { %p4947_p1 = scmp.eq.s32.totalorder %s4941_s23, 0  ;;  %s4949_s22 = sld [smem:[#allocation40_spill]] }
 0x128   : > { %p4197_p6 = por %p4945_p11, %p81_p12  ;;  %s4950_s2 = sld [smem:[#allocation39_spill]] }
 0x129   : > { %p4206_p9 = por %p4947_p1, %p87_p7  ;;  %p69_p13 = scmp.ge.s32.totalorder %s5036_s26, 2 }
 0x12a   : > { %s97_s10 = ssub.s32 %s3671_s17, %s5034_s3  ;;  %s100_s8 = sadd.s32 1, %s4942_s24 }
 0x12b   : > { %s4948_s16 = scalar_select %p4206_p9, 1, 0 }
 0x12c   : > { %p98_p3 = scmp.eq.s32.totalorder %s97_s10, 0  ;;  %s5038_s26 = smov (%p69_p13, %s5036_s26), 0 }
 0x12d   : > { %4951 = sst [smem:[#allocation54_spill]] %s5038_s26  ;;  %s71_s5 = ssub.s32 %s3675_s18, %s5038_s26 }
 0x12e   : > { %s5040_s24 = smov (!%p98_p3, %s4942_s24), %s100_s8  ;;  %p4952_p10 = scmp.eq.s32.totalorder %s4941_s23, 3 }
 0x12f   : > { %p72_p2 = scmp.eq.s32.totalorder %s71_s5, 0  ;;  %p471_p0 = scmp.eq.s32.totalorder %s2557_s20, 3 }
 0x130   : > { %p4225_p8 = por %p4952_p10, %p81_p12  ;;  %s479_s0 = sor.u32 %s97_s10, %s71_s5 }
 0x131   : > { %s482_s7 = sadd.s32 1, %s4943_s13  ;;  %p4236_p5 = por %p471_p0, %p87_p7 }
 0x132   : > { %s4953_s21 = scalar_select %p4225_p8, 1, 0 }
 0x133   : > { %s4231_s9 = scalar_select %p72_p2, %s3659_s29, %s74_s1  }
 0x134   : > { %s4955_s8 = scalar_select %p4236_p5, 1, 0 }
 0x135   : > { %4954 = sst [smem:[#allocation55_spill]] %s4231_s9  ;;  %p480_p4 = scmp.eq.s32.totalorder %s479_s0, 0 }
 0x136   : > { %p4956_p12 = scmp.ne.s32.totalorder %s4949_s22, %s4950_s2  ;;  %s541_s11 = sand.u32 1, %s3659_s29  }
 0x137   : > { %s5042_s13 = smov (!%p480_p4, %s4943_s13), %s482_s7  ;;  %s2562_s20 = sshll.u32 %s541_s11, 3 }
 0x138   : > { %p4243_p11 = por %p4956_p12, %p471_p0  ;;  %s2563_s10 = sshll.u32 %s3675_s18, 7 }
 0x139   : > { %s4958_s1 = sld [smem:[#allocation56_spill]]  ;;  %s545_s3 = scalar_lea.vmem [#allocation2], %s2562_s20 }
 0x13a   : > { %s4957_s23 = scalar_select %p4243_p11, 1, 0 }
 0x13b   : > { %s552_s0 = sshll.u32 %s545_s3, 4  ;;  %p4959_p7 = scmp.lt.s32.totalorder %s3679_s19, 4  ;;  %s4257_s0 = int_to_ptr.vmem [resolvable:$true] %s552_s0 }
 0x13c   : > { %s4961_s18 = sld [smem:[#allocation58_spill]]  ;;  %s542_s3 = scalar_lea.sflag [#allocation3], %s541_s11 }
 0x13d   : > { %p4263_p1 = pnand %p4959_p7, %p4197_p6 }
 0x13f   : > { %s4255_s26 = scalar_lea.hbm %s4958_s1, %s2563_s10  ;;  %s579_s10 = scalar_lea.vmem [#allocation7], %s3898_s15 }
 0x140   : > { %s4274_s5 = sshll.u32 %s579_s10, 4  ;;  %s3263_s20 = scalar_lea.hbm %s4255_s26, 128  ;;  %s587_s5 = int_to_ptr.vmem [resolvable:$true] %s4274_s5 }
 0x141   : > { %p3264_p13 = scmp.ne.s32.totalorder %s4255_s26, %s3263_s20  ;;  %p3265_p3 = pneg %p4263_p1 }
 0x142   : > { %s4962_s9 = smov %s4961_s18  ;;  %s4271_s14 = scalar_lea.hbm %s4961_s18, %s3940_s4 }
 0x143   : > { %p3266_p6 = pnand %p3265_p3, %p3264_p13  ;;  %s3268_s22 = scalar_lea.hbm %s4958_s1, 256 }
 0x144   : > { %p3269_p2 = scmp.lt.u32.totalorder %s4255_s26, %s4958_s1  ;;  %p3270_p0 = scmp.lt.u32.totalorder %s3268_s22, %s3263_s20 }
 0x145   : > { %p3267_p10 = pneg %p3266_p6  ;;  %p3272_p12 = scmp.lt.u32.totalorder %s3263_s20, %s4255_s26 }
 0x146   : > { %p3271_p4 = por %p3270_p0, %p3269_p2 }
 0x148   : > { %p3273_p7 = por %p3272_p12, %p3271_p4 }
 0x14a   : > { %p3274_p11 = pnand %p3273_p7, %p3267_p10 }
 0x14c   : > { %3277 = shalt.err (!%p3274_p11)
}
 0x14d   : > { %s3278_s11 = scalar_lea.vmem %s4257_s0, 128  ;;  %s3691_s17 = smov [#allocation2]  }
 0x14e   : > { %p3279_p13 = scmp.ne.s32.totalorder %s4257_s0, %s3278_s11  ;;  %s3283_s18 = sshll.u32 %s3691_s17, 4  ;;  %s3284_s18 = int_to_ptr.vmem [resolvable:$false] %s3283_s18 }
 0x14f   : > { %s3285_s29 = scalar_lea.vmem %s3284_s18, 256  ;;  %p3286_p8 = scmp.lt.s32.totalorder %s4257_s0, %s3284_s18 }
 0x150   : > { %p3281_p6 = pnand %p3279_p13, %p3265_p3  ;;  %p3287_p2 = scmp.lt.s32.totalorder %s3285_s29, %s3278_s11 }
 0x152   : > { %p3282_p5 = pneg %p3281_p6  ;;  %p3288_p0 = por %p3287_p2, %p3286_p8 }
 0x154   : > { %p3289_p4 = pnand %p3288_p0, %p3282_p5 }
 0x156   : > { %3292 = shalt.err (!%p3289_p4)
}
 0x157   : > { %2825 = dma.hbm_to_vmem [thread:$0]  (!%p4263_p1), %s4255_s26, 128, %s4257_s0, %s542_s3  }
 0x158   : > { %s3293_s10 = scalar_lea.hbm %s4271_s14, 16  ;;  %p4963_p3 = scmp.ne.s32.totalorder %s4928_s25, 0 }
 0x159   : > { %p3294_p11 = scmp.ne.s32.totalorder %s4271_s14, %s3293_s10  ;;  %s3298_s22 = scalar_lea.hbm %s4962_s9, 32 }
 0x15a   : > { %p3299_p8 = scmp.lt.u32.totalorder %s4271_s14, %s4962_s9  ;;  %p3300_p5 = scmp.lt.u32.totalorder %s3298_s22, %s3293_s10 }
 0x15b   : > { %p3296_p10 = pnand %p3294_p11, %p4963_p3  ;;  %p3302_p13 = scmp.lt.u32.totalorder %s3293_s10, %s4271_s14 }
 0x15c   : > { %p3301_p7 = por %p3300_p5, %p3299_p8 }
 0x15d   : > { %p3297_p12 = pneg %p3296_p10 }
 0x15e   : > { %p3303_p6 = por %p3302_p13, %p3301_p7 }
 0x160   : > { %p3304_p2 = pnand %p3303_p6, %p3297_p12 }
 0x162   : > { %3307 = shalt.err (!%p3304_p2)
}
 0x163   : > { %s3308_s26 = scalar_lea.vmem %s587_s5, 16  ;;  %s3692_s0 = smov [#allocation7]  }
 0x164   : > { %p3309_p1 = scmp.ne.s32.totalorder %s587_s5, %s3308_s26  ;;  %s3313_s3 = sshll.u32 %s3692_s0, 4  ;;  %s3314_s3 = int_to_ptr.vmem [resolvable:$false] %s3313_s3 }
 0x165   : > { %s3315_s11 = scalar_lea.vmem %s3314_s3, 32  ;;  %p3316_p11 = scmp.lt.s32.totalorder %s587_s5, %s3314_s3 }
 0x166   : > { %p3311_p0 = pnand %p3309_p1, %p4963_p3  ;;  %p3317_p10 = scmp.lt.s32.totalorder %s3315_s11, %s3308_s26 }
 0x168   : > { %p3312_p4 = pneg %p3311_p0  ;;  %p3318_p9 = por %p3317_p10, %p3316_p11 }
 0x16a   : > { %p3319_p5 = pnand %p3318_p9, %p3312_p4 }
 0x16c   : > { %3322 = shalt.err (!%p3319_p5)
}
 0x16d   : > { %p4964_p8 = scmp.ne.s32.totalorder %s4923_s12, 0  ;;  %s4965_s17 = scalar_lea.sflag [#allocation6], %s3915_s30 }
 0x16e   : > { %s4966_s10 = sld [smem:[#allocation60_spill]]  ;;  %s617_s6 = scalar_lea.vmem [#allocation10], %s3898_s15 }
 0x16f   : > { %2831 = dma.hbm_to_vmem [thread:$0]  (!%p4964_p8), %s4271_s14, 16, %s587_s5, %s4965_s17  }
 0x170   : > { %s624_s22 = sshll.u32 %s617_s6, 4  ;;  %s625_s22 = int_to_ptr.vmem [resolvable:$true] %s624_s22 }
 0x174   : > { %s4325_s20 = scalar_lea.hbm %s4966_s10, %s3940_s4  ;;  %s3328_s14 = scalar_lea.hbm %s4966_s10, 32 }
 0x175   : > { %s3323_s7 = scalar_lea.hbm %s4325_s20, 16  ;;  %p3329_p13 = scmp.lt.u32.totalorder %s4325_s20, %s4966_s10 }
 0x176   : > { %p3324_p9 = scmp.ne.s32.totalorder %s4325_s20, %s3323_s7  ;;  %p3330_p6 = scmp.lt.u32.totalorder %s3328_s14, %s3323_s7 }
 0x177   : > { %p3332_p1 = scmp.lt.u32.totalorder %s3323_s7, %s4325_s20 }
 0x178   : > { %p3326_p12 = pnand %p3324_p9, %p4963_p3  ;;  %p3331_p2 = por %p3330_p6, %p3329_p13 }
 0x17a   : > { %p3327_p7 = pneg %p3326_p12  ;;  %p3333_p0 = por %p3332_p1, %p3331_p2 }
 0x17c   : > { %p3334_p4 = pnand %p3333_p0, %p3327_p7 }
 0x17e   : > { %3337 = shalt.err (!%p3334_p4)
}
 0x17f   : > { %s3338_s3 = scalar_lea.vmem %s625_s22, 16  ;;  %s3693_s11 = smov [#allocation10]  }
 0x180   : > { %p3339_p11 = scmp.ne.s32.totalorder %s625_s22, %s3338_s3  ;;  %s3343_s17 = sshll.u32 %s3693_s11, 4  ;;  %s3344_s17 = int_to_ptr.vmem [resolvable:$false] %s3343_s17 }
 0x181   : > { %s3345_s18 = scalar_lea.vmem %s3344_s17, 32  ;;  %p3346_p9 = scmp.lt.s32.totalorder %s625_s22, %s3344_s17 }
 0x182   : > { %p3341_p10 = pnand %p3339_p11, %p4963_p3  ;;  %p3347_p12 = scmp.lt.s32.totalorder %s3345_s18, %s3338_s3 }
 0x184   : > { %p3342_p5 = pneg %p3341_p10  ;;  %p3348_p8 = por %p3347_p12, %p3346_p9 }
 0x186   : > { %p3349_p6 = pnand %p3348_p8, %p3342_p5 }
 0x188   : > { %3352 = shalt.err (!%p3349_p6)
}
 0x189   : > { %p4967_p13 = scmp.ne.s32.totalorder %s4923_s12, 0  ;;  %s4968_s29 = scalar_lea.sflag [#allocation9], %s3915_s30 }
 0x18a   : > { %s4969_s2 = sld [smem:[#allocation62_spill]]  ;;  %s655_s14 = scalar_lea.vmem [#allocation13], %s3898_s15 }
 0x18b   : > { %2837 = dma.hbm_to_vmem [thread:$0]  (!%p4967_p13), %s4325_s20, 16, %s625_s22, %s4968_s29  }
 0x18c   : > { %s662_s5 = sshll.u32 %s655_s14, 4  ;;  %s663_s5 = int_to_ptr.vmem [resolvable:$true] %s662_s5 }
 0x190   : > { %s4351_s26 = scalar_lea.hbm %s4969_s2, %s3940_s4  ;;  %s3358_s20 = scalar_lea.hbm %s4969_s2, 32 }
 0x191   : > { %s3353_s0 = scalar_lea.hbm %s4351_s26, 16  ;;  %p3359_p1 = scmp.lt.u32.totalorder %s4351_s26, %s4969_s2 }
 0x192   : > { %p3354_p8 = scmp.ne.s32.totalorder %s4351_s26, %s3353_s0  ;;  %p3360_p0 = scmp.lt.u32.totalorder %s3358_s20, %s3353_s0 }
 0x193   : > { %p3362_p11 = scmp.lt.u32.totalorder %s3353_s0, %s4351_s26 }
 0x194   : > { %p3356_p7 = pnand %p3354_p8, %p4963_p3  ;;  %p3361_p4 = por %p3360_p0, %p3359_p1 }
 0x196   : > { %p3357_p2 = pneg %p3356_p7  ;;  %p3363_p10 = por %p3362_p11, %p3361_p4 }
 0x198   : > { %p3364_p5 = pnand %p3363_p10, %p3357_p2 }
 0x19a   : > { %3367 = shalt.err (!%p3364_p5)
}
 0x19b   : > { %s3368_s18 = scalar_lea.vmem %s663_s5, 16  ;;  %s3694_s29 = smov [#allocation13]  }
 0x19c   : > { %p3369_p9 = scmp.ne.s32.totalorder %s663_s5, %s3368_s18  ;;  %s3373_s6 = sshll.u32 %s3694_s29, 4  ;;  %s3374_s6 = int_to_ptr.vmem [resolvable:$false] %s3373_s6 }
 0x19d   : > { %s3375_s7 = scalar_lea.vmem %s3374_s6, 32  ;;  %p3376_p8 = scmp.lt.s32.totalorder %s663_s5, %s3374_s6 }
 0x19e   : > { %p3371_p12 = pnand %p3369_p9, %p4963_p3  ;;  %p3377_p7 = scmp.lt.s32.totalorder %s3375_s7, %s3368_s18 }
 0x1a0   : > { %p3372_p6 = pneg %p3371_p12  ;;  %p3378_p13 = por %p3377_p7, %p3376_p8 }
 0x1a2   : > { %p3379_p0 = pnand %p3378_p13, %p3372_p6 }
 0x1a4   : > { %3382 = shalt.err (!%p3379_p0)
}
 0x1a5   : > { %p4970_p1 = scmp.ne.s32.totalorder %s4923_s12, 0  ;;  %s4971_s14 = scalar_lea.sflag [#allocation12], %s3915_s30 }
 0x1a6   : > { %s4972_s11 = sld [smem:[#allocation64_spill]]  ;;  %s689_s22 = scalar_lea.vmem [#allocation16], %s3898_s15 }
 0x1a7   : > { %2843 = dma.hbm_to_vmem [thread:$0]  (!%p4970_p1), %s4351_s26, 16, %s663_s5, %s4971_s14  }
 0x1a8   : > { %s696_s17 = sshll.u32 %s689_s22, 4  ;;  %s697_s17 = int_to_ptr.vmem [resolvable:$true] %s696_s17 }
 0x1ac   : > { %s4377_s20 = scalar_lea.hbm %s4972_s11, %s3940_s4  ;;  %s3388_s26 = scalar_lea.hbm %s4972_s11, 32 }
 0x1ad   : > { %s3383_s18 = scalar_lea.hbm %s4377_s20, 16  ;;  %p3389_p11 = scmp.lt.u32.totalorder %s4377_s20, %s4972_s11 }
 0x1ae   : > { %p3384_p13 = scmp.ne.s32.totalorder %s4377_s20, %s3383_s18  ;;  %p3390_p10 = scmp.lt.u32.totalorder %s3388_s26, %s3383_s18 }
 0x1af   : > { %p3392_p9 = scmp.lt.u32.totalorder %s3383_s18, %s4377_s20 }
 0x1b0   : > { %p3386_p2 = pnand %p3384_p13, %p4963_p3  ;;  %p3391_p5 = por %p3390_p10, %p3389_p11 }
 0x1b2   : > { %p3387_p4 = pneg %p3386_p2  ;;  %p3393_p12 = por %p3392_p9, %p3391_p5 }
 0x1b4   : > { %p3394_p6 = pnand %p3393_p12, %p3387_p4 }
 0x1b6   : > { %3397 = shalt.err (!%p3394_p6)
}
 0x1b7   : > { %s3398_s14 = scalar_lea.vmem %s697_s17, 16  ;;  %s3695_s0 = smov [#allocation16]  }
 0x1b8   : > { %p3399_p8 = scmp.ne.s32.totalorder %s697_s17, %s3398_s14  ;;  %s3403_s3 = sshll.u32 %s3695_s0, 4  ;;  %s3404_s3 = int_to_ptr.vmem [resolvable:$false] %s3403_s3 }
 0x1b9   : > { %s3405_s22 = scalar_lea.vmem %s3404_s3, 32  ;;  %p3406_p13 = scmp.lt.s32.totalorder %s697_s17, %s3404_s3 }
 0x1ba   : > { %p3401_p7 = pnand %p3399_p8, %p4963_p3  ;;  %p3407_p2 = scmp.lt.s32.totalorder %s3405_s22, %s3398_s14 }
 0x1bc   : > { %p3402_p0 = pneg %p3401_p7  ;;  %p3408_p1 = por %p3407_p2, %p3406_p13 }
 0x1be   : > { %p3409_p10 = pnand %p3408_p1, %p3402_p0 }
 0x1c0   : > { %3412 = shalt.err (!%p3409_p10)
}
 0x1c1   : > { %p4973_p11 = scmp.ne.s32.totalorder %s4923_s12, 0  ;;  %s4974_s18 = scalar_lea.sflag [#allocation15], %s3915_s30 }
 0x1c2   : > { %s4975_s26 = sld [smem:[#allocation66_spill]]  ;;  %s727_s14 = scalar_lea.vmem [#allocation19], %s3898_s15 }
 0x1c3   : > { %2849 = dma.hbm_to_vmem [thread:$0]  (!%p4973_p11), %s4377_s20, 16, %s697_s17, %s4974_s18  }
 0x1c4   : > { %s734_s0 = sshll.u32 %s727_s14, 4  ;;  %s735_s0 = int_to_ptr.vmem [resolvable:$true] %s734_s0 }
 0x1c8   : > { %s4976_s5 = smov %s4975_s26  ;;  %s4403_s7 = scalar_lea.hbm %s4975_s26, %s3940_s4 }
 0x1c9   : > { %s3413_s3 = scalar_lea.hbm %s4403_s7, 16  ;;  %s3418_s20 = scalar_lea.hbm %s4976_s5, 32 }
 0x1ca   : > { %p3414_p1 = scmp.ne.s32.totalorder %s4403_s7, %s3413_s3  ;;  %p3419_p9 = scmp.lt.u32.totalorder %s4403_s7, %s4976_s5 }
 0x1cb   : > { %p3420_p12 = scmp.lt.u32.totalorder %s3418_s20, %s3413_s3  ;;  %p3422_p8 = scmp.lt.u32.totalorder %s3413_s3, %s4403_s7 }
 0x1cc   : > { %p3416_p4 = pnand %p3414_p1, %p4963_p3 }
 0x1cd   : > { %p3421_p6 = por %p3420_p12, %p3419_p9 }
 0x1ce   : > { %p3417_p5 = pneg %p3416_p4 }
 0x1cf   : > { %p3423_p7 = por %p3422_p8, %p3421_p6 }
 0x1d1   : > { %p3424_p0 = pnand %p3423_p7, %p3417_p5 }
 0x1d3   : > { %3427 = shalt.err (!%p3424_p0)
}
 0x1d4   : > { %s3428_s29 = scalar_lea.vmem %s735_s0, 16  ;;  %s3696_s6 = smov [#allocation19]  }
 0x1d5   : > { %p3429_p13 = scmp.ne.s32.totalorder %s735_s0, %s3428_s29  ;;  %s3433_s26 = sshll.u32 %s3696_s6, 4  ;;  %s3434_s26 = int_to_ptr.vmem [resolvable:$false] %s3433_s26 }
 0x1d6   : > { %s3435_s1 = scalar_lea.vmem %s3434_s26, 32  ;;  %p3436_p1 = scmp.lt.s32.totalorder %s735_s0, %s3434_s26 }
 0x1d7   : > { %p3431_p2 = pnand %p3429_p13, %p4963_p3  ;;  %p3437_p4 = scmp.lt.s32.totalorder %s3435_s1, %s3428_s29 }
 0x1d9   : > { %p3432_p10 = pneg %p3431_p2  ;;  %p3438_p11 = por %p3437_p4, %p3436_p1 }
 0x1db   : > { %p3439_p9 = pnand %p3438_p11, %p3432_p10 }
 0x1dd   : > { %3442 = shalt.err (!%p3439_p9)
}
 0x1de   : > { %p4977_p12 = scmp.ne.s32.totalorder %s4923_s12, 0  ;;  %s4978_s14 = scalar_lea.sflag [#allocation18], %s3915_s30 }
 0x1df   : > { %s4979_s20 = sld [smem:[#allocation68_spill]]  ;;  %s765_s18 = scalar_lea.vmem [#allocation22], %s3898_s15 }
 0x1e0   : > { %2855 = dma.hbm_to_vmem [thread:$0]  (!%p4977_p12), %s4403_s7, 16, %s735_s0, %s4978_s14  }
 0x1e1   : > { %s772_s29 = sshll.u32 %s765_s18, 4  ;;  %s773_s29 = int_to_ptr.vmem [resolvable:$true] %s772_s29 }
 0x1e5   : > { %s4429_s17 = scalar_lea.hbm %s4979_s20, %s3940_s4  ;;  %s3448_s7 = scalar_lea.hbm %s4979_s20, 32 }
 0x1e6   : > { %s3443_s6 = scalar_lea.hbm %s4429_s17, 16  ;;  %p3449_p8 = scmp.lt.u32.totalorder %s4429_s17, %s4979_s20 }
 0x1e7   : > { %p3444_p11 = scmp.ne.s32.totalorder %s4429_s17, %s3443_s6  ;;  %p3450_p7 = scmp.lt.u32.totalorder %s3448_s7, %s3443_s6 }
 0x1e8   : > { %p3452_p13 = scmp.lt.u32.totalorder %s3443_s6, %s4429_s17 }
 0x1e9   : > { %p3446_p5 = pnand %p3444_p11, %p4963_p3  ;;  %p3451_p0 = por %p3450_p7, %p3449_p8 }
 0x1eb   : > { %p3447_p6 = pneg %p3446_p5  ;;  %p3453_p2 = por %p3452_p13, %p3451_p0 }
 0x1ed   : > { %p3454_p10 = pnand %p3453_p2, %p3447_p6 }
 0x1ef   : > { %3457 = shalt.err (!%p3454_p10)
}
 0x1f0   : > { %s3458_s15 = scalar_lea.vmem %s773_s29, 16  ;;  %s3697_s4 = smov [#allocation22]  }
 0x1f1   : > { %p3459_p1 = scmp.ne.s32.totalorder %s773_s29, %s3458_s15  ;;  %s3463_s3 = sshll.u32 %s3697_s4, 4  ;;  %s3464_s3 = int_to_ptr.vmem [resolvable:$false] %s3463_s3 }
 0x1f2   : > { %s3465_s22 = scalar_lea.vmem %s3464_s3, 32  ;;  %p3466_p11 = scmp.lt.s32.totalorder %s773_s29, %s3464_s3 }
 0x1f3   : > { %p3461_p4 = pnand %p3459_p1, %p4963_p3  ;;  %p3467_p5 = scmp.lt.s32.totalorder %s3465_s22, %s3458_s15 }
 0x1f5   : > { %p3462_p9 = pneg %p3461_p4  ;;  %p3468_p12 = por %p3467_p5, %p3466_p11 }
 0x1f7   : > { %p3469_p7 = pnand %p3468_p12, %p3462_p9 }
 0x1f9   : > { %3472 = shalt.err (!%p3469_p7)
}
 0x1fa   : > { %p4980_p8 = scmp.ne.s32.totalorder %s4923_s12, 0  ;;  %s4981_s18 = scalar_lea.sflag [#allocation21], %s3915_s30 }
 0x1fb   : > { %s4982_s6 = sld [smem:[#allocation52_spill]] }
 0x1fc   : > { %2861 = dma.hbm_to_vmem [thread:$0]  (!%p4980_p8), %s4429_s17, 16, %s773_s29, %s4981_s18  }
 0x201   : > { %p4983_p6 = scmp.ne.s32.totalorder %s4982_s6, 0 }
 0x202   : > { %s4454_s25 = sand.u32 (!%p4983_p6), 1, %s3655_s28   ;;  %p4984_p3 = scmp.ne.s32.totalorder (!%p4983_p6), %s4948_s16, 0 }
 0x203   : > { %781 = sbr.rel (%p4983_p6) target bundleno = 3488 (0xda0), region = 80  ;;  %s2585_s26 = sshll.u32 (!%p4983_p6), %s4454_s25, 3 }
 0x204   : > { %s784_s1 = scalar_lea.sflag (!%p4983_p6), [#allocation3], %s4454_s25  ;;  %s4460_s7 = scalar_lea.vmem (!%p4983_p6), [#allocation2], %s2585_s26 }
 0x20a   : > { %3586 = dma.done.wait (%p4984_p3), %s784_s1, 128  }
 0x20b   : > { %3588 = vsyncadd (%p4984_p3), %s784_s1, 4294967168  ;;  %s4985_s12 = sld [smem:[#allocation49_spill]]  ;;  %s4986_s30 = sld [smem:[#allocation42_spill]] }
 0x20c   : > { %s4987_s17 = sld [smem:[#allocation50_spill]] }
 0x211   : > { %s4467_s29 = sand.u32 1, %s4985_s12   ;;  %s4470_s0 = sand.u32 1, %s4986_s30  }
 0x212   : > { %s793_s14 = scalar_lea.sflag [#allocation6], %s4467_s29  ;;  %p4988_p12 = scmp.ne.s32.totalorder %s4987_s17, 0 }
 0x214   : > { %3590 = dma.done.wait (%p4988_p12), %s793_s14, 32  }
 0x215   : > { %3592 = vsyncadd (%p4988_p12), %s793_s14, 4294967264  ;;  %s4479_s16 = sshll.u32 %s4470_s0, 4  ;;  %s809_s3 = scalar_lea.sflag [#allocation9], %s4467_s29 }
 0x216   : > { %s812_s22 = scalar_lea.vmem [#allocation8], %s4479_s16 }
 0x217   : > { %3594 = dma.done.wait (%p4988_p12), %s809_s3, 272  }
 0x218   : > { %3596 = vsyncadd (%p4988_p12), %s809_s3, 4294967024  ;;  %s826_s6 = scalar_lea.sflag [#allocation12], %s4467_s29  ;;  %s4491_s1 = scalar_lea.vmem [#allocation11], %s4479_s16 }
 0x219   : > { %3598 = dma.done.wait (%p4988_p12), %s826_s6, 272  }
 0x21a   : > { %3600 = vsyncadd (%p4988_p12), %s826_s6, 4294967024  ;;  %s843_s14 = scalar_lea.sflag [#allocation15], %s4467_s29 }
 0x21b   : > { %3602 = dma.done.wait (%p4988_p12), %s843_s14, 32  }
 0x21c   : > { %3604 = vsyncadd (%p4988_p12), %s843_s14, 4294967264  ;;  %s859_s4 = scalar_lea.sflag [#allocation18], %s4467_s29 }
 0x21d   : > { %3606 = dma.done.wait (%p4988_p12), %s859_s4, 272  }
 0x21e   : > { %3608 = vsyncadd (%p4988_p12), %s859_s4, 4294967024  ;;  %s2589_s6 = sshll.u32 %s4470_s0, 5  ;;  %s876_s30 = scalar_lea.sflag [#allocation21], %s4467_s29 }
 0x21f   : > { %s4514_s14 = scalar_lea.vmem [#allocation20], %s2589_s6 }
 0x220   : > { %3610 = dma.done.wait (%p4988_p12), %s876_s30, 528  }
 0x221   : > { %3612 = vsyncadd (%p4988_p12), %s876_s30, 4294966768  ;;  %s887_s18 = scalar_lea.vmem [#allocation22], %s4470_s0  ;;  %p4989_p0 = scmp.eq.s32.totalorder %s4985_s12, 0 }
 0x223   : > { %3614 = dma.done.wait (%p4989_p0), [#allocation24], 32   ;;  %p4990_p13 = pmov %p4989_p0 }
 0x224   : > { %s4991_s4 = sld [smem:[#allocation40_spill]]  ;;  %s4530_s6 = scalar_lea.vmem [#allocation26], %s2585_s26 }
 0x225   : > { %3616 = vsyncadd (%p4990_p13), [#allocation24], 4294967264  ;;  %s4992_s17 = sld [smem:[#allocation45_spill]] }
 0x22a   : > { %s4884_s3 = sand.u32 1, %s4991_s4  }
 0x22b   : > { %s2593_s29 = sshll.u32 %s4884_s3, 5  ;;  %p2594_p2 = scmp.ne.s32.totalorder %s4992_s17, 0 }
 0x22c   : > { %s4532_s15 = scalar_lea.vmem [#allocation27], %s2593_s29  ;;  %v1007_v0 = vld [vmem:[%s4460_s7] sm:$0xff] (!%p2594_p2)  ;;  %vm1008_vm0 = vcmask (!%p2594_p2), 261120  }
 0x22d   : > { %1006 = sbr.rel (%p2594_p2) target bundleno = 564 (0x234), region = 144  ;;  %1009 = vst.msk [vmem:[%s4530_s6] sm:$0xff] (!%p2594_p2), %vm1008_vm0, %v1007_v0 }
 0x234 PF: > { %v1010_v1 = vld [vmem:[%s4530_s6] sm:$0xff]  ;;  %vm1013_vm1 = vcmask 261120   ;;  %v2995_v8 = vld [vmem:[%s812_s22] sm:$0xff]   ;;  %v3698_v9 = vmov 0.0   ;;  %vm3699_vm2 = vmmov 0   ;;  %s4993_s26 = scalar_lea.vmem [#allocation5], %s4470_s0  ;;  %v1467_v59 = vlaneseq }
 0x235   : > { %v1014_v2 = vsel %vm1013_vm1, %v1010_v1, 0.0  ;;  %2677 = vmatprep.subr.bf16.mxu0 %v3698_v9  ;;  %2691 = vmatprep.subr.bf16.mxu1 %v3698_v9  ;;  %v2996_v10 = vld [vmem:[%s812_s22 + $0x8] sm:$0xff]   ;;  %s4994_s7 = scalar_lea.vmem [#allocation7], %s4470_s0  ;;  %s4995_s12 = scalar_lea.vmem [#allocation10], %s4470_s0  ;;  %vm1285_vm3 = vcmask 1043456   ;;  %vm1281_vm4 = vcmask 64512  }
 0x236   : > { %1015 = vadd.xlane.f32.xlu0 %v1014_v2  ;;  %2678 = vmatpush3.bf16.msra.mxu0 %v2995_v8  ;;  %v2595_v15 = vld [vmem:[%s4993_s26] ss:$0 sm:$0xff]  ;;  %v1468_v60 = vshrl.u32 %v1467_v59, 7  ;;  %v1470_v61 = vand.u32 127, %v1467_v59  ;;  %v1718_v59 = vld [vmem:[%s4491_s1] sm:$0xf] }
 0x237   : > { %2681 = vmatprep.mubr.msk.bf16.mxu0 %vm3699_vm2, %v3698_v9  ;;  %2679 = vmatprep.subr.bf16.mxu0 %v3698_v9  ;;  %v2596_v17 = vld [vmem:[%s4994_s7] ss:$0 sm:$0xff]  ;;  %s4996_s22 = scalar_lea.vmem [#allocation13], %s4470_s0  ;;  %s4999_s4 = scalar_lea.vmem [#allocation14], %s4470_s0  ;;  %vm2067_vm6 = vcmask 523264  }
 0x238   : > { %2693 = vmatprep.mubr.msk.bf16.mxu1 %vm3699_vm2, %v3698_v9  ;;  %v2597_v21 = vld [vmem:[%s4995_s12] ss:$0 sm:$0xff]  ;;  %vm1471_vm5 = vcmp.le.s32.totalorder %v1470_v61, %v1468_v60  ;;  %s5000_s29 = scalar_lea.vmem [#allocation16], %s4470_s0 }
 0x23a   : > { %2680 = vmatpush3.bf16.msra.mxu0 %v2996_v10 }
 0x23b   : > { %2685 = vmatprep.subr.bf16.mxu0 %v3698_v9 }
 0x2c3   : > { %v1016_v3 = vpop.xlane.xlu0 %1015 }
 0x2c4   : > { %v1018_v4 = vmul.f32 0.03125, %v1016_v3 }
 0x2c6   : > { %v1019_v5 = vsub.f32 %v1010_v1, %v1018_v4 }
 0x2c8   : > { %v1020_v6 = vmul.f32 %v1019_v5, %v1019_v5 }
 0x2ca   : > { %v1021_v7 = vsel %vm1013_vm1, %v1020_v6, 0.0 }
 0x2cb   : > { %1022 = vadd.xlane.f32.xlu0 %v1021_v7 }
 0x358   : > { %v1023_v11 = vpop.xlane.xlu0 %1022 }
 0x359   : > { %v1024_v12 = vmul.f32 0.03125, %v1023_v11 }
 0x35b   : > { %v1025_v13 = vadd.f32 1e-05, %v1024_v12 }
 0x35d   : > { %3003 = vrsqrt.f32 %v1025_v13 }
 0x367   : > { %v3004_v14 = vpop.eup %3003 }
 0x368   : > { %v1027_v16 = vmul.f32 %v3004_v14, %v1019_v5 }
 0x36a   : > { %v1034_v18 = vmul.f32 %v2595_v15, %v1027_v16 }
 0x36c   : > { %v4556_v19 = vadd.f32 %v2596_v17, %v1034_v18 }
 0x36e   : > { %v1042_v20 = vpack.c.bf16 %v4556_v19, %v4556_v19 }
 0x370   : > { %2682 = vmatmul.mubr.msk.bf16.vlgmr.msra.gmra.mrb[0].mxu0 %vm1013_vm1, %v1042_v20 }
 0x371   : > { %2687 = vmatprep.mubr.msk.bf16.mxu0 %vm3699_vm2, %v3698_v9 }
 0x443   : > { %v1103_v22 = vpop.f32.mrb[0].mxu0 }
 0x444   : > { %v2683_v23 = vpop.f32.mrb[1].mxu0  ;;  %v1104_v24 = vadd.f32 %v2597_v21, %v1103_v22 }
 0x445   : > { %v1106_v25 = vpop.f32.mrb[2].mxu0 }
 0x446   : > { %1109 = vxpose.xlu1.b32.start.end [1/1] (short) (narrow) %v1104_v24, 96  ;;  %v2684_v26 = vpop.f32.mrb[3].mxu0 }
 0x4c6   : > { %v1125_v27 = vpop.trf.xlu1 }
 0x4c7   : > { %1141 = vxpose.xlu1.b32.start.end [1/1] (short) (narrow) %v1125_v27, 8 }
 0x4ca   : > { %v1126_v28 = vpop.trf.xlu1 }
 0x4cb   : > { %1173 = vxpose.xlu0.b32.start.end [1/1] (short) (narrow) %v1126_v28, 8 }
 0x4ce   : > { %v1127_v29 = vpop.trf.xlu1 }
 0x4cf   : > { %1205 = vxpose.xlu1.b32.start.end [1/1] (short) (narrow) %v1127_v29, 8 }
 0x4d2   : > { %v1128_v30 = vpop.trf.xlu1 }
 0x4d3   : > { %1237 = vxpose.xlu0.b32.start.end [1/1] (short) (narrow) %v1128_v30, 8 }
 0x4d6   : > { %v1129_v31 = vpop.trf.xlu1 }
 0x4d7   : > { %v1269_v32 = vpack.c.bf16 %v1129_v31, %v1129_v31 }
 0x4d9   : > { %v1287_v33 = vsel %vm1285_vm3, %v1269_v32, 0 }
 0x4da   : > { %2686 = vmatpush3.bf16.msra.mxu0 %v1287_v33  ;;  %v1130_v34 = vpop.trf.xlu1 }
 0x4db   : > { %v1270_v35 = vpack.c.bf16 %v1130_v34, %v1130_v34  ;;  %2697 = vmatprep.subr.bf16.mxu0 %v3698_v9 }
 0x4dd   : > { %v1333_v36 = vsel %vm1285_vm3, %v1270_v35, 0 }
 0x4de   : > { %2692 = vmatpush3.bf16.msra.mxu1 %v1333_v36  ;;  %v1131_v37 = vpop.trf.xlu1 }
 0x4df   : > { %2703 = vmatprep.subr.bf16.mxu1 %v3698_v9  ;;  %v1271_v43 = vpack.c.bf16 %v1131_v37, %v1131_v37 }
 0x4e1   : > { %v1379_v46 = vsel %vm1285_vm3, %v1271_v43, 0 }
 0x4e2   : > { %v1132_v38 = vpop.trf.xlu1 }
 0x4e3   : > { %v1272_v47 = vpack.c.bf16 %v1132_v38, %v1132_v38 }
 0x4e5   : > { %v1425_v50 = vsel %vm1285_vm3, %v1272_v47, 0 }
 0x4e6   : > { %v1133_v39 = vpop.trf.xlu1 }
 0x4e7   : > { %v1273_v51 = vpack.c.bf16 %v1133_v39, %v1133_v39 }
 0x4e9   : > { %v1534_v54 = vsel %vm1281_vm4, %v1273_v51, 0 }
 0x4ea   : > { %v1134_v40 = vpop.trf.xlu1 }
 0x4eb   : > { %v1274_v55 = vpack.c.bf16 %v1134_v40, %v1134_v40 }
 0x4ed   : > { %v1580_v58 = vsel %vm1281_vm4, %v1274_v55, 0 }
 0x4ee   : > { %v4569_v41 = vpop.trf.xlu1 }
 0x4f2   : > { %v4571_v42 = vpop.trf.xlu1 }
 0x547   : > { %v1157_v44 = vpop.trf.xlu1 }
 0x548   : > { %v1277_v45 = vpack.c.bf16 %v1157_v44, %v1157_v44 }
 0x54a   : > { %2688 = vmatmul.mubr.msk.bf16.vlgmr.msra.gmra.mrb[4].mxu0 %vm1281_vm4, %v1277_v45 }
 0x54b   : > { %2698 = vmatpush3.bf16.msra.mxu0 %v1379_v46  ;;  %v1189_v48 = vpop.trf.xlu0  ;;  %2699 = vmatprep.mubr.msk.bf16.mxu0 %vm3699_vm2, %v3698_v9 }
 0x54c   : > { %v1278_v49 = vpack.c.bf16 %v1189_v48, %v1189_v48  ;;  %2709 = vmatprep.subr.bf16.mxu0 %v3698_v9 }
 0x54e   : > { %2694 = vmatmul.mubr.msk.bf16.vlgmr.msra.gmra.mrb[0].mxu1 %vm1281_vm4, %v1278_v49 }
 0x54f   : > { %2704 = vmatpush3.bf16.msra.mxu1 %v1425_v50  ;;  %v1221_v52 = vpop.trf.xlu1  ;;  %2705 = vmatprep.mubr.msk.bf16.mxu1 %vm3699_vm2, %v3698_v9  ;;  %v1275_v50 = vpack.c.bf16 %v4569_v41, %v4569_v41 }
 0x550   : > { %v1279_v53 = vpack.c.bf16 %v1221_v52, %v1221_v52  ;;  %2715 = vmatprep.subr.bf16.mxu1 %v3698_v9 }
 0x551   : > { %v1626_v55 = vsel %vm1281_vm4, %v1275_v50, 0 }
 0x552   : > { %2700 = vmatmul.mubr.msk.bf16.vlgmr.msra.gmra.mrb[8].mxu0 %vm1281_vm4, %v1279_v53 }
 0x553   : > { %v1253_v56 = vpop.trf.xlu0  ;;  %2711 = vmatprep.mubr.msk.bf16.mxu0 %vm3699_vm2, %v3698_v9 }
 0x554   : > { %v1280_v57 = vpack.c.bf16 %v1253_v56, %v1253_v56  ;;  %2710 = vmatpush3.bf16.xpose.msra.mxu0 %v1534_v54  ;;  %v1276_v56 = vpack.c.bf16 %v4571_v42, %v4571_v42 }
 0x555   : > { %2721 = vmatprep.subr.bf16.mxu0 %v3698_v9 }
 0x556   : > { %2706 = vmatmul.mubr.msk.bf16.vlgmr.msra.gmra.mrb[4].mxu1 %vm1281_vm4, %v1280_v57  ;;  %v1672_v60 = vsel %vm1281_vm4, %v1276_v56, 0 }
 0x557   : > { %2717 = vmatprep.mubr.msk.bf16.mxu1 %vm3699_vm2, %v3698_v9 }
 0x558   : > { %2716 = vmatpush3.bf16.xpose.msra.mxu1 %v1580_v58 }
 0x559   : > { %2727 = vmatprep.subr.bf16.mxu1 %v3698_v9 }
 0x61d   : > { %v1323_v62 = vpop.f32.mrb[4].mxu0 }
 0x61e   : > { %v1474_v63 = vsel %vm1471_vm5, %v1323_v62, -1e+30  ;;  %v2689_v0 = vpop.f32.mrb[5].mxu0  ;;  %v1726_v62 = vsel %vm1285_vm3, %v1718_v59, 0 }
 0x61f   : > { %v1326_v1 = vpop.f32.mrb[6].mxu0  ;;  %v1478_v2 = vsel %vm1281_vm4, %v1474_v63, -inf  ;;  %v1719_v0 = vld [vmem:[%s4491_s1 + $0x4] sm:$0xf] }
 0x620   : > { %1479 = vmax.xlane.f32.xlu1 %v1478_v2  ;;  %v2690_v3 = vpop.f32.mrb[7].mxu0 }
 0x621   : > { %v1369_v4 = vpop.f32.mrb[0].mxu1  ;;  %v1772_v3 = vsel %vm1285_vm3, %v1719_v0, 0 }
 0x622   : > { %v1475_v5 = vsel %vm1471_vm5, %v1369_v4, -1e+30  ;;  %v2695_v6 = vpop.f32.mrb[1].mxu1  ;;  %v1720_v4 = vld [vmem:[%s4491_s1 + $0x8] sm:$0xf] }
 0x623   : > { %v1372_v7 = vpop.f32.mrb[2].mxu1  ;;  %v1481_v8 = vsel %vm1281_vm4, %v1475_v5, -inf }
 0x624   : > { %1482 = vmax.xlane.f32.xlu0 %v1481_v8  ;;  %v2696_v10 = vpop.f32.mrb[3].mxu1  ;;  %v1818_v8 = vsel %vm1285_vm3, %v1720_v4, 0 }
 0x625   : > { %v1415_v11 = vpop.f32.mrb[8].mxu0 }
 0x626   : > { %v1476_v12 = vsel %vm1471_vm5, %v1415_v11, -1e+30  ;;  %v2701_v13 = vpop.f32.mrb[9].mxu0  ;;  %v1721_v11 = vld [vmem:[%s4491_s1 + $0xc] sm:$0xf]  ;;  %s4997_s1 = scalar_lea.vmem [#allocation17], %s4479_s16 }
 0x627   : > { %v1418_v14 = vpop.f32.mrb[10].mxu0  ;;  %v1484_v15 = vsel %vm1281_vm4, %v1476_v12, -inf  ;;  %s4998_s30 = smov %s4997_s1  ;;  %s5001_s16 = scalar_lea.vmem [#allocation19], %s4470_s0 }
 0x628   : > { %1485 = vmax.xlane.f32.xlu1 %v1484_v15  ;;  %v2702_v16 = vpop.f32.mrb[11].mxu0 }
 0x629   : > { %v1461_v17 = vpop.f32.mrb[4].mxu1  ;;  %v1864_v16 = vsel %vm1285_vm3, %v1721_v11, 0  ;;  %v3000_v11 = vld [vmem:[%s4514_s14 + $0x8] sm:$0xff]  }
 0x62a   : > { %v1477_v18 = vsel %vm1471_vm5, %v1461_v17, -1e+30  ;;  %v2707_v20 = vpop.f32.mrb[5].mxu1 }
 0x62b   : > { %v1464_v21 = vpop.f32.mrb[6].mxu1  ;;  %v1487_v22 = vsel %vm1281_vm4, %v1477_v18, -inf }
 0x62c   : > { %v2708_v23 = vpop.f32.mrb[7].mxu1  ;;  %1488 = vmax.xlane.f32.xlu1 %v1487_v22 }
 0x6ad   : > { %v1480_v24 = vpop.xlane.xlu1 %1479 }
 0x6ae   : > { %v1490_v25 = vsub.f32 %v1474_v63, %v1480_v24 }
 0x6b0   : > { %v1494_v26 = vmul.f32 1.442695, %v1490_v25 }
 0x6b1   : > { %v1483_v27 = vpop.xlane.xlu0 %1482 }
 0x6b2   : > { %3005 = vpow2.f32 %v1494_v26  ;;  %v1491_v28 = vsub.f32 %v1475_v5, %v1483_v27 }
 0x6b4   : > { %v1496_v29 = vmul.f32 1.442695, %v1491_v28 }
 0x6b5   : > { %v1486_v30 = vpop.xlane.xlu1 %1485 }
 0x6b6   : > { %3007 = vpow2.f32 %v1496_v29  ;;  %v1492_v31 = vsub.f32 %v1476_v12, %v1486_v30 }
 0x6b8   : > { %v1498_v32 = vmul.f32 1.442695, %v1492_v31 }
 0x6b9   : > { %v1489_v33 = vpop.xlane.xlu1 %1488 }
 0x6ba   : > { %3009 = vpow2.f32 %v1498_v32  ;;  %v1493_v34 = vsub.f32 %v1477_v18, %v1489_v33 }
 0x6bc   : > { %v3006_v35 = vpop.eup %3005  ;;  %v1500_v36 = vmul.f32 1.442695, %v1493_v34 }
 0x6bd   : > { %v1502_v37 = vsel %vm1281_vm4, %v3006_v35, 0.0 }
 0x6be   : > { %3011 = vpow2.f32 %v1500_v36  ;;  %1503 = vadd.xlane.f32.xlu1 %v1502_v37 }
 0x6c0   : > { %v3008_v38 = vpop.eup %3007 }
 0x6c1   : > { %v1505_v39 = vsel %vm1281_vm4, %v3008_v38, 0.0 }
 0x6c2   : > { %1506 = vadd.xlane.f32.xlu0 %v1505_v39 }
 0x6c4   : > { %v3010_v40 = vpop.eup %3009 }
 0x6c5   : > { %v1508_v43 = vsel %vm1281_vm4, %v3010_v40, 0.0 }
 0x6c6   : > { %1509 = vadd.xlane.f32.xlu1 %v1508_v43 }
 0x6c8   : > { %v3012_v44 = vpop.eup %3011 }
 0x6c9   : > { %v1511_v45 = vsel %vm1281_vm4, %v3012_v44, 0.0 }
 0x6ca   : > { %1512 = vadd.xlane.f32.xlu0 %v1511_v45 }
 0x74b   : > { %v1504_v46 = vpop.xlane.xlu1 %1503 }
 0x74c   : > { %3013 = vrcp.f32 %v1504_v46 }
 0x74f   : > { %v1507_v47 = vpop.xlane.xlu0 %1506 }
 0x750   : > { %3015 = vrcp.f32 %v1507_v47 }
 0x753   : > { %v1510_v48 = vpop.xlane.xlu1 %1509 }
 0x754   : > { %3017 = vrcp.f32 %v1510_v48 }
 0x756   : > { %v3014_v49 = vpop.eup %3013 }
 0x757   : > { %v1518_v51 = vmul.f32 %v3014_v49, %v3006_v35  ;;  %v1513_v52 = vpop.xlane.xlu0 %1512 }
 0x758   : > { %3019 = vrcp.f32 %v1513_v52 }
 0x759   : > { %1522 = vst.msk [vmem:[%s4532_s15] sm:$0xff] %vm1281_vm4, %v1518_v51  ;;  %v1526_v53 = vpack.c.bf16 %v1518_v51, %v1518_v51  ;;  %v2613_v51 = vld [vmem:[%s4996_s22] ss:$0 sm:$0xff] }
 0x75a   : > { %v3016_v54 = vpop.eup %3015 }
 0x75b   : > { %v1519_v57 = vmul.f32 %v3016_v54, %v3008_v38  ;;  %2712 = vmatmul.mubr.msk.bf16.vlgmr.msra.gmra.mrb[12].mxu0 %vm1281_vm4, %v1526_v53 }
 0x75c   : > { %2722 = vmatpush3.bf16.xpose.msra.mxu0 %v1626_v55  ;;  %2723 = vmatprep.mubr.msk.bf16.mxu0 %vm3699_vm2, %v3698_v9 }
 0x75d   : > { %1523 = vst.msk [vmem:[%s4532_s15 + $0x8] sm:$0xff] %vm1281_vm4, %v1519_v57  ;;  %v1527_v41 = vpack.c.bf16 %v1519_v57, %v1519_v57  ;;  %2733 = vmatprep.subr.bf16.mxu0 %v3698_v9 }
 0x75e   : > { %v3018_v58 = vpop.eup %3017 }
 0x75f   : > { %v1520_v61 = vmul.f32 %v3018_v58, %v3010_v40  ;;  %2718 = vmatmul.mubr.msk.bf16.vlgmr.msra.gmra.mrb[8].mxu1 %vm1281_vm4, %v1527_v41 }
 0x760   : > { %2728 = vmatpush3.bf16.xpose.msra.mxu1 %v1672_v60  ;;  %2729 = vmatprep.mubr.msk.bf16.mxu1 %vm3699_vm2, %v3698_v9 }
 0x761   : > { %1524 = vst.msk [vmem:[%s4532_s15 + $0x10] sm:$0xff] %vm1281_vm4, %v1520_v61  ;;  %v1528_v42 = vpack.c.bf16 %v1520_v61, %v1520_v61  ;;  %2739 = vmatprep.subr.bf16.mxu1 %v3698_v9 }
 0x762   : > { %v3020_v63 = vpop.eup %3019 }
 0x763   : > { %v1521_v1 = vmul.f32 %v3020_v63, %v3012_v44  ;;  %2724 = vmatmul.mubr.msk.bf16.vlgmr.msra.gmra.mrb[16].mxu0 %vm1281_vm4, %v1528_v42  ;;  %v2998_v63 = vld [vmem:[%s4998_s30 + $0x8] sm:$0xff]  }
 0x764   : > { %2734 = vmatpush3.bf16.msra.mxu0 %v1726_v62  ;;  %2735 = vmatprep.mubr.msk.bf16.mxu0 %vm3699_vm2, %v3698_v9  ;;  %v2997_v62 = vld [vmem:[%s4997_s1] sm:$0xff]  }
 0x765   : > { %1525 = vst.msk [vmem:[%s4532_s15 + $0x18] sm:$0xff] %vm1281_vm4, %v1521_v1  ;;  %v1529_v2 = vpack.c.bf16 %v1521_v1, %v1521_v1  ;;  %2745 = vmatprep.subr.bf16.mxu0 %v3698_v9 }
 0x767   : > { %2730 = vmatmul.mubr.msk.bf16.vlgmr.msra.gmra.mrb[12].mxu1 %vm1281_vm4, %v1529_v2 }
 0x768   : > { %2740 = vmatpush3.bf16.msra.mxu1 %v1772_v3  ;;  %2741 = vmatprep.mubr.msk.bf16.mxu1 %vm3699_vm2, %v3698_v9  ;;  %v2614_v3 = vld [vmem:[%s4999_s4] ss:$0 sm:$0xff] }
 0x769   : > { %2751 = vmatprep.subr.bf16.mxu1 %v3698_v9 }
 0x82e   : > { %v1570_v5 = vpop.f32.mrb[12].mxu0 }
 0x82f   : > { %v1714_v6 = vpack.c.bf16 %v1570_v5, %v1570_v5  ;;  %v2713_v7 = vpop.f32.mrb[13].mxu0  ;;  %v2615_v5 = vld [vmem:[%s5000_s29] ss:$0 sm:$0xff] }
 0x830   : > { %v1573_v10 = vpop.f32.mrb[14].mxu0 }
 0x831   : > { %v2714_v12 = vpop.f32.mrb[15].mxu0  ;;  %2736 = vmatmul.mubr.msk.bf16.vlgmr.msra.gmra.mrb[20].mxu0 %vm1281_vm4, %v1714_v6  ;;  %v2999_v10 = vld [vmem:[%s4514_s14] sm:$0xff]  }
 0x832   : > { %v1616_v13 = vpop.f32.mrb[8].mxu1  ;;  %2746 = vmatpush3.bf16.msra.mxu0 %v1818_v8  ;;  %2747 = vmatprep.mubr.msk.bf16.mxu0 %vm3699_vm2, %v3698_v9  ;;  %v3001_v12 = vld [vmem:[%s4514_s14 + $0x10] sm:$0xff]  }
 0x833   : > { %v1715_v14 = vpack.c.bf16 %v1616_v13, %v1616_v13  ;;  %v2719_v15 = vpop.f32.mrb[9].mxu1  ;;  %2757 = vmatprep.subr.bf16.mxu0 %v3698_v9  ;;  %v3002_v13 = vld [vmem:[%s4514_s14 + $0x18] sm:$0xff]   ;;  %s5002_s14 = sld [smem:[#allocation45_spill]] }
 0x834   : > { %v1619_v17 = vpop.f32.mrb[10].mxu1 }
 0x835   : > { %v2720_v18 = vpop.f32.mrb[11].mxu1  ;;  %2742 = vmatmul.mubr.msk.bf16.vlgmr.msra.gmra.mrb[16].mxu1 %vm1281_vm4, %v1715_v14  ;;  %v2616_v14 = vld [vmem:[%s5001_s16] ss:$0 sm:$0xff] }
 0x836   : > { %2752 = vmatpush3.bf16.msra.mxu1 %v1864_v16  ;;  %v1662_v20 = vpop.f32.mrb[16].mxu0  ;;  %2753 = vmatprep.mubr.msk.bf16.mxu1 %vm3699_vm2, %v3698_v9 }
 0x837   : > { %v1716_v21 = vpack.c.bf16 %v1662_v20, %v1662_v20  ;;  %v2725_v22 = vpop.f32.mrb[17].mxu0  ;;  %2765 = vmatprep.subr.bf16.mxu1 %v3698_v9 }
 0x838   : > { %v1665_v23 = vpop.f32.mrb[18].mxu0 }
 0x839   : > { %v2726_v24 = vpop.f32.mrb[19].mxu0  ;;  %2748 = vmatmul.mubr.msk.bf16.vlgmr.msra.gmra.mrb[24].mxu0 %vm1281_vm4, %v1716_v21  ;;  %p2626_p10 = scmp.ne.s32.totalorder %s5002_s14, 1 }
 0x83a   : > { %v1708_v25 = vpop.f32.mrb[12].mxu1  ;;  %2761 = vmatprep.mubr.msk.bf16.mxu0 %vm3699_vm2, %v3698_v9  ;;  %2758 = vmatpush3.bf16.msra.mxu0 %v2997_v62 }
 0x83b   : > { %v1717_v26 = vpack.c.bf16 %v1708_v25, %v1708_v25  ;;  %v2731_v27 = vpop.f32.mrb[13].mxu1  ;;  %2759 = vmatprep.subr.bf16.mxu0 %v3698_v9 }
 0x83c   : > { %v1711_v28 = vpop.f32.mrb[14].mxu1 }
 0x83d   : > { %v2732_v29 = vpop.f32.mrb[15].mxu1  ;;  %2754 = vmatmul.mubr.msk.bf16.vlgmr.msra.gmra.mrb[20].mxu1 %vm1281_vm4, %v1717_v26 }
 0x83e   : > { %2773 = vmatprep.mubr.msk.bf16.mxu1 %vm3699_vm2, %v3698_v9  ;;  %2760 = vmatpush3.bf16.msra.mxu0 %v2998_v63 }
 0x83f   : > { %2766 = vmatpush3.bf16.msra.mxu1 %v2999_v10 }
 0x840   : > { %2767 = vmatprep.subr.bf16.mxu1 %v3698_v9 }
 0x843   : > { %2768 = vmatpush3.bf16.msra.mxu1 %v3000_v11 }
 0x844   : > { %2769 = vmatprep.subr.bf16.mxu1 %v3698_v9 }
 0x847   : > { %2770 = vmatpush3.bf16.msra.mxu1 %v3001_v12 }
 0x848   : > { %2771 = vmatprep.subr.bf16.mxu1 %v3698_v9 }
 0x84b   : > { %2772 = vmatpush3.bf16.msra.mxu1 %v3002_v13 }
 0x904   : > { %v1762_v30 = vpop.f32.mrb[20].mxu0 }
 0x905   : > { %v2737_v31 = vpop.f32.mrb[21].mxu0  ;;  %v1906_v35 = vsel %vm1013_vm1, %v1762_v30, 0.0  ;;  %v2620_v30 = vld [vmem:[%s887_s18] ss:$0 sm:$0xff] }
 0x906   : > { %v1765_v32 = vpop.f32.mrb[22].mxu0 }
 0x907   : > { %v2738_v33 = vpop.f32.mrb[23].mxu0 }
 0x908   : > { %v1808_v34 = vpop.f32.mrb[16].mxu1 }
 0x909   : > { %v1907_v36 = vsel %vm1013_vm1, %v1808_v34, 0.0  ;;  %v2743_v37 = vpop.f32.mrb[17].mxu1 }
 0x90a   : > { %v1908_v38 = vadd.f32 %v1907_v36, %v1906_v35  ;;  %v1811_v39 = vpop.f32.mrb[18].mxu1 }
 0x90b   : > { %v2744_v40 = vpop.f32.mrb[19].mxu1 }
 0x90c   : > { %v1854_v43 = vpop.f32.mrb[24].mxu0 }
 0x90d   : > { %v1909_v44 = vsel %vm1013_vm1, %v1854_v43, 0.0  ;;  %v2749_v45 = vpop.f32.mrb[25].mxu0 }
 0x90e   : > { %v1910_v46 = vadd.f32 %v1909_v44, %v1908_v38  ;;  %v1857_v47 = vpop.f32.mrb[26].mxu0 }
 0x90f   : > { %v2750_v48 = vpop.f32.mrb[27].mxu0 }
 0x910   : > { %v1900_v49 = vpop.f32.mrb[20].mxu1 }
 0x911   : > { %v1911_v50 = vsel %vm1013_vm1, %v1900_v49, 0.0  ;;  %v2755_v52 = vpop.f32.mrb[21].mxu1  ;;  %v2627_v49 = vld [vmem:[#allocation23] ss:$0 sm:$0xff] (!%p2626_p10) }
 0x912   : > { %v1912_v53 = vadd.f32 %v1911_v50, %v1910_v46  ;;  %v1903_v54 = vpop.f32.mrb[22].mxu1 }
 0x913   : > { %v2756_v55 = vpop.f32.mrb[23].mxu1 }
 0x914   : > { %v1920_v56 = vadd.f32 %v2613_v51, %v1912_v53  ;;  %v2628_v51 = vld [vmem:[#allocation25] ss:$0 sm:$0xff] (!%p2626_p10) }
 0x916   : > { %v1921_v57 = vadd.f32 %v1920_v56, %v4556_v19 }
 0x918   : > { %v1924_v41 = vsel %vm1013_vm1, %v1921_v57, 0.0 }
 0x919   : > { %1925 = vadd.xlane.f32.xlu1 %v1924_v41 }
 0x9a6   : > { %v1926_v58 = vpop.xlane.xlu1 %1925 }
 0x9a7   : > { %v1927_v59 = vmul.f32 0.03125, %v1926_v58 }
 0x9a9   : > { %v1928_v60 = vsub.f32 %v1921_v57, %v1927_v59 }
 0x9ab   : > { %v1929_v61 = vmul.f32 %v1928_v60, %v1928_v60 }
 0x9ad   : > { %v1930_v42 = vsel %vm1013_vm1, %v1929_v61, 0.0 }
 0x9ae   : > { %1931 = vadd.xlane.f32.xlu0 %v1930_v42 }
 0xa3b   : > { %v1932_v19 = vpop.xlane.xlu0 %1931 }
 0xa3c   : > { %v1933_v0 = vmul.f32 0.03125, %v1932_v19 }
 0xa3e   : > { %v1934_v1 = vadd.f32 1e-05, %v1933_v0 }
 0xa40   : > { %3021 = vrsqrt.f32 %v1934_v1 }
 0xa4a   : > { %v3022_v2 = vpop.eup %3021 }
 0xa4b   : > { %v1936_v4 = vmul.f32 %v3022_v2, %v1928_v60 }
 0xa4d   : > { %v1943_v6 = vmul.f32 %v2614_v3, %v1936_v4 }
 0xa4f   : > { %v1950_v7 = vadd.f32 %v2615_v5, %v1943_v6 }
 0xa51   : > { %v1951_v8 = vpack.c.bf16 %v1950_v7, %v1950_v7 }
 0xa53   : > { %2762 = vmatmul.mubr.msk.bf16.vlgmr.msra.gmra.mrb[28].mxu0 %vm1013_vm1, %v1951_v8 }
 0xb26   : > { %v2012_v15 = vpop.f32.mrb[28].mxu0 }
 0xb27   : > { %v2013_v16 = vadd.f32 %v2616_v14, %v2012_v15  ;;  %v2763_v17 = vpop.f32.mrb[29].mxu0 }
 0xb28   : > { %v2015_v18 = vpop.f32.mrb[30].mxu0 }
 0xb29   : > { %v2018_v20 = vmul.f32 %v2013_v16, %v2013_v16  ;;  %v2764_v21 = vpop.f32.mrb[31].mxu0 }
 0xb2b   : > { %v2019_v22 = vmul.f32 %v2018_v20, %v2013_v16 }
 0xb2d   : > { %v2020_v23 = vmul.f32 0.044715, %v2019_v22 }
 0xb2f   : > { %v2021_v24 = vadd.f32 %v2020_v23, %v2013_v16 }
 0xb31   : > { %v2022_v25 = vmul.f32 0.7978846, %v2021_v24 }
 0xb33   : > { %3023 = vtanh.f32 %v2022_v25 }
 0xb3d   : > { %v3024_v26 = vpop.eup %3023 }
 0xb3e   : > { %v2024_v27 = vadd.f32 1.0, %v3024_v26 }
 0xb40   : > { %v2025_v28 = vmul.f32 0.5, %v2024_v27 }
 0xb42   : > { %v2026_v9 = vmul.f32 %v2025_v28, %v2013_v16 }
 0xb44   : > { %v2027_v29 = vpack.c.bf16 %v2026_v9, %v2026_v9 }
 0xb46   : > { %2774 = vmatmul.mubr.msk.bf16.vlgmr.msra.gmra.mrb[24].mxu1 %vm2067_vm6, %v2027_v29 }
 0xc16   : > { %2114 = sbr.rel (%p2626_p10) target bundleno = 3416 (0xd58), region = 148 }
 0xc19   : > { %v2105_v31 = vpop.f32.mrb[24].mxu1 }
 0xc1a   : > { %v2106_v32 = vadd.f32 %v2620_v30, %v2105_v31  ;;  %v2775_v33 = vpop.f32.mrb[25].mxu1 }
 0xc1b   : > { %v2108_v34 = vpop.f32.mrb[26].mxu1 }
 0xc1c   : > { %v2111_v35 = vadd.f32 %v2106_v32, %v1950_v7  ;;  %v2776_v36 = vpop.f32.mrb[27].mxu1 }
 0xc1e   : > { %v2117_v37 = vsel %vm1013_vm1, %v2111_v35, 0.0 }
 0xc1f   : > { %2118 = vadd.xlane.f32.xlu0 %v2117_v37 }
 0xcac   : > { %v2119_v38 = vpop.xlane.xlu0 %2118 }
 0xcad   : > { %v2120_v39 = vmul.f32 0.03125, %v2119_v38 }
 0xcaf   : > { %v2121_v40 = vsub.f32 %v2111_v35, %v2120_v39 }
 0xcb1   : > { %v2122_v43 = vmul.f32 %v2121_v40, %v2121_v40 }
 0xcb3   : > { %v2123_v44 = vsel %vm1013_vm1, %v2122_v43, 0.0 }
 0xcb4   : > { %2124 = vadd.xlane.f32.xlu0 %v2123_v44 }
 0xd41   : > { %v2125_v45 = vpop.xlane.xlu0 %2124 }
 0xd42   : > { %v2126_v46 = vmul.f32 0.03125, %v2125_v45 }
 0xd44   : > { %v2127_v47 = vadd.f32 1e-05, %v2126_v46 }
 0xd46   : > { %3025 = vrsqrt.f32 %v2127_v47 }
 0xd50   : > { %v3026_v48 = vpop.eup %3025 }
 0xd51   : > { %v2129_v50 = vmul.f32 %v3026_v48, %v2121_v40 }
 0xd53   : > { %v2136_v52 = vmul.f32 %v2627_v49, %v2129_v50 }
 0xd55   : > { %v2143_v53 = vadd.f32 %v2628_v51, %v2136_v52 }
 0xd57   : > { %2144 = vst.msk [vmem:[%s4530_s6] sm:$0xff] %vm1013_vm1, %v2143_v53 }
 0xd58 PF: > { %s5003_s0 = sld [smem:[#allocation45_spill]] }
 0xd5e   : > { %p2629_p1 = scmp.eq.s32.totalorder %s5003_s0, 1 }
 0xd5f   : > { %2149 = vst.msk [vmem:[%s4530_s6] sm:$0xff] (!%p2629_p1), %vm1013_vm1, %v2111_v35 }
 0xd60   : > { %2148 = sbr.rel (%p2629_p1) target bundleno = 3431 (0xd67), region = 152 }
 0xd67 PF: > { %s5004_s18 = sld [smem:[#allocation46_spill]]  ;;  %s5005_s12 = sld [smem:[#allocation71_spill]] }
 0xd68   : > { %s2169_s1 = sshll.u32 %s4530_s6, 4  ;;  %s2151_s30 = scalar_lea.sflag [#allocation4], %s4454_s25  ;;  %s2170_s1 = int_to_ptr.vmem [resolvable:$true] %s2169_s1 }
 0xd69   : > { %s3473_s4 = scalar_lea.vmem %s2170_s1, 128  ;;  %p5006_p9 = scmp.ne.s32.totalorder %s4953_s21, 0 }
 0xd6a   : > { %p3474_p4 = scmp.ne.s32.totalorder %s2170_s1, %s3473_s4  ;;  %s3700_s29 = smov [#allocation26]  }
 0xd6b   : > { %s3477_s16 = sshll.u32 %s3700_s29, 4  ;;  %s3478_s16 = int_to_ptr.vmem [resolvable:$false] %s3477_s16 }
 0xd6c   : > { %p3475_p11 = pnand %p3474_p4, %p5006_p9  ;;  %s3479_s14 = scalar_lea.vmem %s3478_s16, 256 }
 0xd6d   : > { %s2632_s17 = sshll.u32 %s5004_s18, 7  ;;  %p3480_p7 = scmp.lt.s32.totalorder %s2170_s1, %s3478_s16 }
 0xd6e   : > { %s4699_s22 = scalar_lea.hbm %s5005_s12, %s2632_s17  ;;  %p3476_p5 = pneg %p3475_p11 }
 0xd6f   : > { %p3481_p8 = scmp.lt.s32.totalorder %s3479_s14, %s3473_s4 }
 0xd71   : > { %p3482_p6 = por %p3481_p8, %p3480_p7 }
 0xd73   : > { %p3483_p3 = pnand %p3482_p6, %p3476_p5 }
 0xd75   : > { %3486 = shalt.err (!%p3483_p3)
}
 0xd76   : > { %s3487_s25 = scalar_lea.hbm %s4699_s22, 128  ;;  %s3491_s17 = scalar_lea.hbm %s5005_s12, 256 }
 0xd77   : > { %p3488_p12 = scmp.ne.s32.totalorder %s4699_s22, %s3487_s25  ;;  %p3492_p2 = scmp.lt.u32.totalorder %s4699_s22, %s5005_s12 }
 0xd78   : > { %p3493_p10 = scmp.lt.u32.totalorder %s3491_s17, %s3487_s25  ;;  %p3495_p4 = scmp.lt.u32.totalorder %s3487_s25, %s4699_s22 }
 0xd79   : > { %p3489_p0 = pnand %p3488_p12, %p5006_p9 }
 0xd7a   : > { %p3494_p1 = por %p3493_p10, %p3492_p2 }
 0xd7b   : > { %p3490_p13 = pneg %p3489_p0 }
 0xd7c   : > { %p3496_p11 = por %p3495_p4, %p3494_p1 }
 0xd7e   : > { %p3497_p5 = pnand %p3496_p11, %p3490_p13 }
 0xd80   : > { %3500 = shalt.err (!%p3497_p5)
}
 0xd81   : > { %s5007_s4 = sld [smem:[#allocation45_spill]]  ;;  %s5008_s29 = sld [smem:[#allocation40_spill]] }
 0xd82   : > { %s5009_s16 = sld [smem:[#allocation51_spill]]  ;;  %s2634_s6 = sshll.u32 %s5004_s18, 3 }
 0xd83   : > { %2811 = dma.vmem_to_hbm [thread:$0]  (%p5006_p9), %s2170_s1, 128, %s4699_s22, %s2151_s30  }
 0xd84   : > { %s2184_s26 = sshll.u32 %s4532_s15, 4  ;;  %s5010_s3 = sld [smem:[#allocation72_spill]]  ;;  %s4723_s26 = int_to_ptr.vmem [resolvable:$true] %s2184_s26 }
 0xd85   : > { %s3501_s9 = scalar_lea.vmem %s4723_s26, 512  ;;  %s3701_s15 = smov [#allocation27]  }
 0xd86   : > { %p3502_p9 = scmp.ne.s32.totalorder %s4723_s26, %s3501_s9  ;;  %s3505_s18 = sshll.u32 %s3701_s15, 4  ;;  %s3506_s18 = int_to_ptr.vmem [resolvable:$false] %s3505_s18 }
 0xd87   : > { %s2633_s14 = sshll.u32 %s5007_s4, 2  ;;  %s5011_s2 = sand.u32 1, %s5008_s29  }
 0xd88   : > { %s2181_s0 = sadd.s32 %s2634_s6, %s2633_s14  ;;  %s4732_s5 = scalar_lea.sflag [#allocation28], %s5011_s2 }
 0xd89   : > { %s2635_s7 = sshll.u32 %s2181_s0, 7  ;;  %p5012_p7 = scmp.ne.s32.totalorder %s5009_s16, 0 }
 0xd8a   : > { %s4728_s21 = scalar_lea.hbm %s5010_s3, %s2635_s7  ;;  %s3507_s22 = scalar_lea.vmem %s3506_s18, 1024 }
 0xd8b   : > { %p3503_p8 = pnand %p3502_p9, %p5012_p7  ;;  %p3508_p3 = scmp.lt.s32.totalorder %s4723_s26, %s3506_s18 }
 0xd8c   : > { %p3509_p12 = scmp.lt.s32.totalorder %s3507_s22, %s3501_s9 }
 0xd8d   : > { %p3504_p6 = pneg %p3503_p8 }
 0xd8e   : > { %p3510_p0 = por %p3509_p12, %p3508_p3 }
 0xd90   : > { %p3511_p13 = pnand %p3510_p0, %p3504_p6 }
 0xd92   : > { %3514 = shalt.err (!%p3511_p13)
}
 0xd93   : > { %s3515_s2 = scalar_lea.hbm %s4728_s21, 512  ;;  %s3519_s4 = scalar_lea.hbm %s5010_s3, 2048 }
 0xd94   : > { %p3516_p2 = scmp.ne.s32.totalorder %s4728_s21, %s3515_s2  ;;  %p3520_p4 = scmp.lt.u32.totalorder %s4728_s21, %s5010_s3 }
 0xd95   : > { %p3521_p11 = scmp.lt.u32.totalorder %s3519_s4, %s3515_s2  ;;  %p3523_p9 = scmp.lt.u32.totalorder %s3515_s2, %s4728_s21 }
 0xd96   : > { %p3517_p10 = pnand %p3516_p2, %p5012_p7 }
 0xd97   : > { %p3522_p5 = por %p3521_p11, %p3520_p4 }
 0xd98   : > { %p3518_p1 = pneg %p3517_p10 }
 0xd99   : > { %p3524_p8 = por %p3523_p9, %p3522_p5 }
 0xd9b   : > { %p3525_p6 = pnand %p3524_p8, %p3518_p1 }
 0xd9d   : > { %3528 = shalt.err (!%p3525_p6)
}
 0xd9e   : > { %s3702_s9 = smov 128   ;;  %s3703_s6 = smov 8  }
 0xd9f   : > { %2812 = dma.vmem_to_hbm [thread:$0]  (%p5012_p7), %s4723_s26, 512, %s4728_s21, %s4732_s5, %s3702_s9, %s3702_s9, %s3703_s6  }
 0xda0 PF: > { %p2874_p3 = scmp.ge.s32.totalorder %s3679_s19, 2  ;;  %s2199_s0 = sand.u32 1, %s3651_s27  }
 0xda1   : > { %p5013_p12 = scmp.ne.s32.totalorder %s4955_s8, 0  ;;  %s2200_s7 = scalar_lea.sflag [#allocation4], %s2199_s0 }
 0xda3   : > { %p2863_p0 = pnand %p2874_p3, %p5013_p12 }
 0xda5   : > { %3618 = dma.done.wait (!%p2863_p0), %s2200_s7, 128  }
 0xda6   : > { %3620 = vsyncadd (!%p2863_p0), %s2200_s7, 4294967168  ;;  %s5014_s25 = sld [smem:[#allocation39_spill]]  ;;  %p5015_p13 = scmp.ne.s32.totalorder %s4957_s23, 0 }
 0xda8   : > { %p2866_p2 = pnand %p2874_p3, %p5015_p13 }
 0xdac   : > { %s2208_s17 = sand.u32 1, %s5014_s25  }
 0xdad   : > { %s2209_s15 = scalar_lea.sflag [#allocation28], %s2208_s17 }
 0xdae   : > { %3622 = dma.done.wait (!%p2866_p2), %s2209_s15, 512  }
 0xdaf   : > { %3624 = vsyncadd (!%p2866_p2), %s2209_s15, 4294966784  ;;  %s55_s19 = sadd.s32 1, %s3679_s19   ;;  %s5017_s21 = sld [smem:[#allocation40_spill]] }
 0xdb0   : > { %p4764_p7 = scmp.ge.s32.totalorder %s55_s19, 6   ;;  %s5018_s22 = sld [smem:[#allocation41_spill]] }
 0xdb1   : > { %s5019_s27 = sld [smem:[#allocation42_spill]]  ;;  %s5020_s25 = sld [smem:[#allocation43_spill]] }
 0xdb2   : > { %s5021_s8 = smov %s5040_s24  ;;  %s5022_s16 = sld [smem:[#allocation44_spill]] }
 0xdb3   : > { %s5023_s29 = sld [smem:[#allocation55_spill]]  ;;  %s5024_s30 = sld [smem:[#allocation47_spill]] }
 0xdb4   : > { %s5025_s0 = sld [smem:[#allocation48_spill]]  ;;  %s5026_s17 = sld [smem:[#allocation53_spill]] }
 0xdb5   : > { %s5027_s18 = sld [smem:[#allocation54_spill]]  ;;  %s5028_s23 = smov %s5042_s13 }
 0xdb6   : > { %s5030_s26 = smov %s5021_s8  ;;  %54 = sbr.rel (!%p4764_p7) target bundleno = 43 (0x2b), region = 306 }
 0xdb7   : > { %s5029_s24 = smov %s5019_s27  ;;  %s5031_s27 = smov %s3655_s28 }
 0xdb8   : > { %s5032_s28 = smov %s5022_s16 }
 0xdbd   :  { %2214 = vsyncpa [#allocation3], 1 }
 0xdbe   :  { %2216 = vsyncpa [#allocation3 + $0x1], 1 }
 0xdbf   :  { %2217 = vsyncpa [#allocation6], 1 }
 0xdc0   :  { %2219 = vsyncpa [#allocation6 + $0x1], 1 }
 0xdc1   :  { %2220 = vsyncpa [#allocation9], 1 }
 0xdc2   :  { %2222 = vsyncpa [#allocation9 + $0x1], 1 }
 0xdc3   :  { %2223 = vsyncpa [#allocation12], 1 }
 0xdc4   :  { %2225 = vsyncpa [#allocation12 + $0x1], 1 }
 0xdc5   :  { %2226 = vsyncpa [#allocation15], 1 }
 0xdc6   :  { %2228 = vsyncpa [#allocation15 + $0x1], 1 }
 0xdc7   :  { %2229 = vsyncpa [#allocation18], 1 }
 0xdc8   :  { %2231 = vsyncpa [#allocation18 + $0x1], 1 }
 0xdc9   :  { %2232 = vsyncpa [#allocation21], 1 }
 0xdca   :  { %2234 = vsyncpa [#allocation21 + $0x1], 1 }
 0xdcb   :  { %2235 = vsyncpa [#allocation24], 1 }
 0xdcc   :  { %2236 = vsyncpa [#allocation4], 1 }
 0xdcd   :  { %2238 = vsyncpa [#allocation4 + $0x1], 1 }
 0xdce   :  { %2239 = vsyncpa [#allocation28], 1 }
 0xdcf   :  { %2241 = vsyncpa [#allocation28 + $0x1], 1 }

</bundles_post_ra>
